<compile_context>
chip_gen: v7x
topology: tpu7x:2x2x1
jax: 0.10.0
libtpu: 0.0.40
codegen_flags: <defaults>
</compile_context>

<pallas_src>
import functools

import jax
import jax.numpy as jnp
import numpy as np
from jax.experimental import pallas as pl
from jax.experimental.pallas import tpu as pltpu

WIN_SIZE = 11
WIN_SIGMA = 1.5
DATA_RANGE = 1.0
K1, K2 = 0.01, 0.03
SSIM_WEIGHT = 0.1
_C1 = (K1 * DATA_RANGE) ** 2
_C2 = (K2 * DATA_RANGE) ** 2


def _gauss_1d(win_size, sigma):
    coords = np.arange(win_size, dtype=np.float32) - win_size // 2
    g = np.exp(-(coords ** 2) / (2.0 * sigma ** 2))
    return (g / g.sum()).astype(np.float32)


def _round_up(x, m):
    return -(-x // m) * m


def _vmem_limit_bytes():
    """Generation-aware scoped-VMEM budget (v7x: 64 MiB, v5e/v6e: 128 MiB)."""
    cap = None
    try:
        cap = getattr(pltpu.get_tpu_info(), "vmem_capacity_bytes", None)
    except Exception:
        cap = None
    if not cap:
        cap = 64 << 20            # conservative: v7x has the smallest VMEM
    return int(min(max(cap * 3 // 4, 32 << 20), 100 << 20))


def _pick_block_batch(nc, h, w, in_bytes, vmem_limit):
    """Images per grid step.

    Preferences (in order): per-step working set fits the VMEM budget,
    nb = nc // B >= 2 (both v7x TensorCores busy on the "parallel" axis),
    B*H >= 512 sublanes per step, then the largest B (fewest grid steps).
    """
    hp = _round_up(h, 8)
    wp = _round_up(w, 128)
    # Conservative per-image working set: double-buffered pred/targ blocks
    # plus the f32 temporaries (x, y, x*x, y*y, x*y, tap intermediates,
    # 5 filtered maps and the SSIM-map temporaries).
    per_img = hp * wp * (2 * 2 * in_bytes + 26 * 4)
    cap = max(1, (vmem_limit // 2) // per_img)

    candidates = [d for d in range(1, nc + 1) if nc % d == 0 and d <= cap]
    if not candidates:
        candidates = [1]

    def score(d):
        return ((nc // d) >= 2, min(d * h, 512), d)

    return max(candidates, key=score)


def _combined_loss_kernel(pred_ref, targ_ref, out_ref, *, h_out, w_out, taps):
    x = pred_ref[...].astype(jnp.float32)        # (B, H, W)
    y = targ_ref[...].astype(jnp.float32)        # (B, H, W)

    # MSE partial sum first (keeps `diff` live range short).
    diff = x - y
    sse_local = jnp.sum(diff * diff)

    def gfilt(z):
        """11-tap separable Gaussian, valid padding, all on the VPU.

        H (sublane) taps first, then W (lane) taps; every slice has a static
        Python-int offset so it lowers to cheap shifted vector accesses.
        """
        th = taps[0] * z[:, 0:h_out, :]
        for k in range(1, len(taps)):
            th = th + taps[k] * z[:, k:k + h_out, :]
        out = taps[0] * th[:, :, 0:w_out]
        for k in range(1, len(taps)):
            out = out + taps[k] * th[:, :, k:k + w_out]
        return out

    mu1 = gfilt(x)
    mu2 = gfilt(y)
    e_xx = gfilt(x * x)
    e_yy = gfilt(y * y)
    e_xy = gfilt(x * y)

    mu12 = mu1 * mu2
    mu1_sq = mu1 * mu1
    mu2_sq = mu2 * mu2
    # Single fused division for the SSIM map (exact divide: the 1e-5
    # tolerance rules out the approx-reciprocal EUP path).
    num = (2.0 * mu12 + _C1) * (2.0 * (e_xy - mu12) + _C2)
    den = (mu1_sq + mu2_sq + _C1) * ((e_xx - mu1_sq) + (e_yy - mu2_sq) + _C2)
    ssim_local = jnp.sum(num / den)

    # Lane-dense (8,128) partial-sum tile: sse at [0,0], ssim sum at [0,1].
    row = jax.lax.broadcasted_iota(jnp.int32, (8, 128), 0)
    col = jax.lax.broadcasted_iota(jnp.int32, (8, 128), 1)
    tile = jnp.where((row == 0) & (col == 0), sse_local, 0.0)
    tile = tile + jnp.where((row == 0) & (col == 1), ssim_local, 0.0)
    out_ref[...] = tile


def combined_loss(predicted, target, ssim_weight=SSIM_WEIGHT):
    """predicted / target: NCHW arrays (the module uses channel == 1)."""
    n, c, h, w = predicted.shape
    assert h >= WIN_SIZE and w >= WIN_SIZE, "spatial dims must be >= win_size"
    nc = n * c
    h_out = h - WIN_SIZE + 1
    w_out = w - WIN_SIZE + 1

    vmem_limit = _vmem_limit_bytes()
    in_bytes = predicted.dtype.itemsize
    b = _pick_block_batch(nc, h, w, in_bytes, vmem_limit)
    nb = nc // b

    # Gaussian taps are baked into the kernel as Python constants: no filter
    # constants to DMA or double-buffer.
    taps = tuple(float(v) for v in _gauss_1d(WIN_SIZE, WIN_SIGMA))

    # Keep native dtype; the f32 cast happens inside the kernel.
    pred3 = predicted.reshape(nc, h, w)
    targ3 = target.reshape(nc, h, w)

    kernel = functools.partial(_combined_loss_kernel,
                               h_out=h_out, w_out=w_out, taps=taps)
    partial_sums = pl.pallas_call(
        kernel,
        out_shape=jax.ShapeDtypeStruct((nb * 8, 128), jnp.float32),
        grid_spec=pltpu.PrefetchScalarGridSpec(
            num_scalar_prefetch=0,
            grid=(nb,),
            in_specs=[
                pl.BlockSpec((b, h, w), lambda i: (i, 0, 0)),
                pl.BlockSpec((b, h, w), lambda i: (i, 0, 0)),
            ],
            out_specs=pl.BlockSpec((8, 128), lambda i: (i, 0)),
        ),
        compiler_params=pltpu.CompilerParams(
            dimension_semantics=("parallel",),
            vmem_limit_bytes=vmem_limit),
    )(pred3, targ3)

    parts = partial_sums.reshape(nb, 8, 128)
    sse_sum = jnp.sum(parts[:, 0, 0])
    ssim_sum = jnp.sum(parts[:, 0, 1])

    mse = sse_sum / (nc * h * w)
    ssim = 1.0 - ssim_sum / (nc * h_out * w_out)
    combined = mse + ssim_weight * ssim
    return combined, mse, ssim


def _reference(predicted, target, ssim_weight=SSIM_WEIGHT):
    """Pure-JAX reference (mirrors pytorch_msssim SSIM, valid padding)."""
    n, c, h, w = predicted.shape
    g = _gauss_1d(WIN_SIZE, WIN_SIGMA)
    h_out = h - WIN_SIZE + 1
    w_out = w - WIN_SIZE + 1

    def band(out_len, in_len):
        m = np.zeros((out_len, in_len), dtype=np.float32)
        rows = np.arange(out_len)[:, None]
        cols = rows + np.arange(WIN_SIZE)[None, :]
        m[rows, cols] = g[None, :]
        return m

    gh = jnp.asarray(band(h_out, h))
    gwt = jnp.asarray(band(w_out, w).T)

    def gfilt(z):  # z: (NC, H, W)
        return jnp.einsum('oh,nhw,wp->nop', gh, z, gwt)

    x = predicted.reshape(n * c, h, w).astype(jnp.float32)
    y = target.reshape(n * c, h, w).astype(jnp.float32)
    mu1, mu2 = gfilt(x), gfilt(y)
    s1 = gfilt(x * x) - mu1 * mu1
    s2 = gfilt(y * y) - mu2 * mu2
    s12 = gfilt(x * y) - mu1 * mu2
    cs = (2 * s12 + _C2) / (s1 + s2 + _C2)
    ssim_map = ((2 * mu1 * mu2 + _C1) / (mu1 * mu1 + mu2 * mu2 + _C1)) * cs
    mse = jnp.mean((x - y) ** 2)
    ssim = 1.0 - jnp.mean(ssim_map)
    return mse + ssim_weight * ssim, mse, ssim


if __name__ == "__main__":
    key = jax.random.PRNGKey(0)
    k1, k2 = jax.random.split(key)
    # SSIM module is configured with channel=1; spatial must be >= win_size=11.
    pred = jax.random.uniform(k1, (2, 1, 16, 16), dtype=jnp.float32)
    targ = jax.random.uniform(k2, (2, 1, 16, 16), dtype=jnp.float32)

    combined, mse, ssim = jax.block_until_ready(combined_loss(pred, targ))
    ref_combined, ref_mse, ref_ssim = _reference(pred, targ)

    assert np.allclose(np.asarray(combined), np.asarray(ref_combined), rtol=1e-5, atol=1e-5)
    assert np.allclose(np.asarray(mse), np.asarray(ref_mse), rtol=1e-5, atol=1e-5)
    assert np.allclose(np.asarray(ssim), np.asarray(ref_ssim), rtol=1e-5, atol=1e-5)

    print("KERNEL_OK")
</pallas_src>

<mosaic_0001>
module attributes {stable_mosaic.version = 11 : i64} {
  func.func @_combined_loss_kernel(%arg0: i32, %arg1: memref<1x16x16xf32, #tpu.memory_space<vmem>>, %arg2: memref<1x16x16xf32, #tpu.memory_space<vmem>>, %arg3: memref<8x128xf32, #tpu.memory_space<vmem>>) attributes {dimension_semantics = [#tpu.dimension_semantics<parallel>], iteration_bounds = array<i64: 2>, scalar_prefetch = 0 : i64, scratch_operands = 0 : i64, tpu.core_type = #tpu.core_type<tc>, window_params = [{transform_indices = @transform_0, window_bounds = array<i64: 1, 16, 16>}, {transform_indices = @transform_1, window_bounds = array<i64: 1, 16, 16>}, {transform_indices = @transform_2, window_bounds = array<i64: 8, 128>}]} {
    %c0 = arith.constant 0 : index
    %c0_0 = arith.constant 0 : index
    %c0_1 = arith.constant 0 : index
    %0 = vector.load %arg1[%c0, %c0_0, %c0_1] : memref<1x16x16xf32, #tpu.memory_space<vmem>>, vector<1x16x16xf32>
    %c0_2 = arith.constant 0 : index
    %c0_3 = arith.constant 0 : index
    %c0_4 = arith.constant 0 : index
    %1 = vector.load %arg2[%c0_2, %c0_3, %c0_4] : memref<1x16x16xf32, #tpu.memory_space<vmem>>, vector<1x16x16xf32>
    %2 = arith.subf %0, %1 : vector<1x16x16xf32>
    %3 = arith.mulf %2, %2 : vector<1x16x16xf32>
    %4 = vector.shape_cast %3 : vector<1x16x16xf32> to vector<1x1x16x16xf32>
    %cst = arith.constant dense<0.000000e+00> : vector<1xf32>
    %5 = vector.multi_reduction <add>, %4, %cst [1, 2, 3] : vector<1x1x16x16xf32> to vector<1xf32>
    %6 = vector.shape_cast %5 : vector<1xf32> to vector<1x1x1x1xf32>
    %7 = vector.extract %6[0, 0, 0, 0] : f32 from vector<1x1x1x1xf32>
    %8 = vector.extract_strided_slice %0 {offsets = [0, 0, 0], sizes = [1, 6, 16], strides = [1, 1, 1]} : vector<1x16x16xf32> to vector<1x6x16xf32>
    %cst_5 = arith.constant 0.00102838036 : f32
    %9 = vector.broadcast %cst_5 : f32 to vector<1x6x16xf32>
    %10 = arith.mulf %9, %8 : vector<1x6x16xf32>
    %11 = vector.extract_strided_slice %0 {offsets = [0, 1, 0], sizes = [1, 6, 16], strides = [1, 1, 1]} : vector<1x16x16xf32> to vector<1x6x16xf32>
    %cst_6 = arith.constant 0.00759875868 : f32
    %12 = vector.broadcast %cst_6 : f32 to vector<1x6x16xf32>
    %13 = arith.mulf %12, %11 : vector<1x6x16xf32>
    %14 = arith.addf %10, %13 : vector<1x6x16xf32>
    %15 = vector.extract_strided_slice %0 {offsets = [0, 2, 0], sizes = [1, 6, 16], strides = [1, 1, 1]} : vector<1x16x16xf32> to vector<1x6x16xf32>
    %cst_7 = arith.constant 0.0360007733 : f32
    %16 = vector.broadcast %cst_7 : f32 to vector<1x6x16xf32>
    %17 = arith.mulf %16, %15 : vector<1x6x16xf32>
    %18 = arith.addf %14, %17 : vector<1x6x16xf32>
    %19 = vector.extract_strided_slice %0 {offsets = [0, 3, 0], sizes = [1, 6, 16], strides = [1, 1, 1]} : vector<1x16x16xf32> to vector<1x6x16xf32>
    %cst_8 = arith.constant 0.109360702 : f32
    %20 = vector.broadcast %cst_8 : f32 to vector<1x6x16xf32>
    %21 = arith.mulf %20, %19 : vector<1x6x16xf32>
    %22 = arith.addf %18, %21 : vector<1x6x16xf32>
    %23 = vector.extract_strided_slice %0 {offsets = [0, 4, 0], sizes = [1, 6, 16], strides = [1, 1, 1]} : vector<1x16x16xf32> to vector<1x6x16xf32>
    %cst_9 = arith.constant 0.213005543 : f32
    %24 = vector.broadcast %cst_9 : f32 to vector<1x6x16xf32>
    %25 = arith.mulf %24, %23 : vector<1x6x16xf32>
    %26 = arith.addf %22, %25 : vector<1x6x16xf32>
    %27 = vector.extract_strided_slice %0 {offsets = [0, 5, 0], sizes = [1, 6, 16], strides = [1, 1, 1]} : vector<1x16x16xf32> to vector<1x6x16xf32>
    %cst_10 = arith.constant 0.266011745 : f32
    %28 = vector.broadcast %cst_10 : f32 to vector<1x6x16xf32>
    %29 = arith.mulf %28, %27 : vector<1x6x16xf32>
    %30 = arith.addf %26, %29 : vector<1x6x16xf32>
    %31 = vector.extract_strided_slice %0 {offsets = [0, 6, 0], sizes = [1, 6, 16], strides = [1, 1, 1]} : vector<1x16x16xf32> to vector<1x6x16xf32>
    %cst_11 = arith.constant 0.213005543 : f32
    %32 = vector.broadcast %cst_11 : f32 to vector<1x6x16xf32>
    %33 = arith.mulf %32, %31 : vector<1x6x16xf32>
    %34 = arith.addf %30, %33 : vector<1x6x16xf32>
    %35 = vector.extract_strided_slice %0 {offsets = [0, 7, 0], sizes = [1, 6, 16], strides = [1, 1, 1]} : vector<1x16x16xf32> to vector<1x6x16xf32>
    %cst_12 = arith.constant 0.109360702 : f32
    %36 = vector.broadcast %cst_12 : f32 to vector<1x6x16xf32>
    %37 = arith.mulf %36, %35 : vector<1x6x16xf32>
    %38 = arith.addf %34, %37 : vector<1x6x16xf32>
    %39 = vector.extract_strided_slice %0 {offsets = [0, 8, 0], sizes = [1, 6, 16], strides = [1, 1, 1]} : vector<1x16x16xf32> to vector<1x6x16xf32>
    %cst_13 = arith.constant 0.0360007733 : f32
    %40 = vector.broadcast %cst_13 : f32 to vector<1x6x16xf32>
    %41 = arith.mulf %40, %39 : vector<1x6x16xf32>
    %42 = arith.addf %38, %41 : vector<1x6x16xf32>
    %43 = vector.extract_strided_slice %0 {offsets = [0, 9, 0], sizes = [1, 6, 16], strides = [1, 1, 1]} : vector<1x16x16xf32> to vector<1x6x16xf32>
    %cst_14 = arith.constant 0.00759875868 : f32
    %44 = vector.broadcast %cst_14 : f32 to vector<1x6x16xf32>
    %45 = arith.mulf %44, %43 : vector<1x6x16xf32>
    %46 = arith.addf %42, %45 : vector<1x6x16xf32>
    %47 = vector.extract_strided_slice %0 {offsets = [0, 10, 0], sizes = [1, 6, 16], strides = [1, 1, 1]} : vector<1x16x16xf32> to vector<1x6x16xf32>
    %cst_15 = arith.constant 0.00102838036 : f32
    %48 = vector.broadcast %cst_15 : f32 to vector<1x6x16xf32>
    %49 = arith.mulf %48, %47 : vector<1x6x16xf32>
    %50 = arith.addf %46, %49 : vector<1x6x16xf32>
    %51 = vector.extract_strided_slice %50 {offsets = [0, 0, 0], sizes = [1, 6, 6], strides = [1, 1, 1]} : vector<1x6x16xf32> to vector<1x6x6xf32>
    %cst_16 = arith.constant 0.00102838036 : f32
    %52 = vector.broadcast %cst_16 : f32 to vector<1x6x6xf32>
    %53 = arith.mulf %52, %51 : vector<1x6x6xf32>
    %54 = vector.extract_strided_slice %50 {offsets = [0, 0, 1], sizes = [1, 6, 6], strides = [1, 1, 1]} : vector<1x6x16xf32> to vector<1x6x6xf32>
    %cst_17 = arith.constant 0.00759875868 : f32
    %55 = vector.broadcast %cst_17 : f32 to vector<1x6x6xf32>
    %56 = arith.mulf %55, %54 : vector<1x6x6xf32>
    %57 = arith.addf %53, %56 : vector<1x6x6xf32>
    %58 = vector.extract_strided_slice %50 {offsets = [0, 0, 2], sizes = [1, 6, 6], strides = [1, 1, 1]} : vector<1x6x16xf32> to vector<1x6x6xf32>
    %cst_18 = arith.constant 0.0360007733 : f32
    %59 = vector.broadcast %cst_18 : f32 to vector<1x6x6xf32>
    %60 = arith.mulf %59, %58 : vector<1x6x6xf32>
    %61 = arith.addf %57, %60 : vector<1x6x6xf32>
    %62 = vector.extract_strided_slice %50 {offsets = [0, 0, 3], sizes = [1, 6, 6], strides = [1, 1, 1]} : vector<1x6x16xf32> to vector<1x6x6xf32>
    %cst_19 = arith.constant 0.109360702 : f32
    %63 = vector.broadcast %cst_19 : f32 to vector<1x6x6xf32>
    %64 = arith.mulf %63, %62 : vector<1x6x6xf32>
    %65 = arith.addf %61, %64 : vector<1x6x6xf32>
    %66 = vector.extract_strided_slice %50 {offsets = [0, 0, 4], sizes = [1, 6, 6], strides = [1, 1, 1]} : vector<1x6x16xf32> to vector<1x6x6xf32>
    %cst_20 = arith.constant 0.213005543 : f32
    %67 = vector.broadcast %cst_20 : f32 to vector<1x6x6xf32>
    %68 = arith.mulf %67, %66 : vector<1x6x6xf32>
    %69 = arith.addf %65, %68 : vector<1x6x6xf32>
    %70 = vector.extract_strided_slice %50 {offsets = [0, 0, 5], sizes = [1, 6, 6], strides = [1, 1, 1]} : vector<1x6x16xf32> to vector<1x6x6xf32>
    %cst_21 = arith.constant 0.266011745 : f32
    %71 = vector.broadcast %cst_21 : f32 to vector<1x6x6xf32>
    %72 = arith.mulf %71, %70 : vector<1x6x6xf32>
    %73 = arith.addf %69, %72 : vector<1x6x6xf32>
    %74 = vector.extract_strided_slice %50 {offsets = [0, 0, 6], sizes = [1, 6, 6], strides = [1, 1, 1]} : vector<1x6x16xf32> to vector<1x6x6xf32>
    %cst_22 = arith.constant 0.213005543 : f32
    %75 = vector.broadcast %cst_22 : f32 to vector<1x6x6xf32>
    %76 = arith.mulf %75, %74 : vector<1x6x6xf32>
    %77 = arith.addf %73, %76 : vector<1x6x6xf32>
    %78 = vector.extract_strided_slice %50 {offsets = [0, 0, 7], sizes = [1, 6, 6], strides = [1, 1, 1]} : vector<1x6x16xf32> to vector<1x6x6xf32>
    %cst_23 = arith.constant 0.109360702 : f32
    %79 = vector.broadcast %cst_23 : f32 to vector<1x6x6xf32>
    %80 = arith.mulf %79, %78 : vector<1x6x6xf32>
    %81 = arith.addf %77, %80 : vector<1x6x6xf32>
    %82 = vector.extract_strided_slice %50 {offsets = [0, 0, 8], sizes = [1, 6, 6], strides = [1, 1, 1]} : vector<1x6x16xf32> to vector<1x6x6xf32>
    %cst_24 = arith.constant 0.0360007733 : f32
    %83 = vector.broadcast %cst_24 : f32 to vector<1x6x6xf32>
    %84 = arith.mulf %83, %82 : vector<1x6x6xf32>
    %85 = arith.addf %81, %84 : vector<1x6x6xf32>
    %86 = vector.extract_strided_slice %50 {offsets = [0, 0, 9], sizes = [1, 6, 6], strides = [1, 1, 1]} : vector<1x6x16xf32> to vector<1x6x6xf32>
    %cst_25 = arith.constant 0.00759875868 : f32
    %87 = vector.broadcast %cst_25 : f32 to vector<1x6x6xf32>
    %88 = arith.mulf %87, %86 : vector<1x6x6xf32>
    %89 = arith.addf %85, %88 : vector<1x6x6xf32>
    %90 = vector.extract_strided_slice %50 {offsets = [0, 0, 10], sizes = [1, 6, 6], strides = [1, 1, 1]} : vector<1x6x16xf32> to vector<1x6x6xf32>
    %cst_26 = arith.constant 0.00102838036 : f32
    %91 = vector.broadcast %cst_26 : f32 to vector<1x6x6xf32>
    %92 = arith.mulf %91, %90 : vector<1x6x6xf32>
    %93 = arith.addf %89, %92 : vector<1x6x6xf32>
    %94 = vector.extract_strided_slice %1 {offsets = [0, 0, 0], sizes = [1, 6, 16], strides = [1, 1, 1]} : vector<1x16x16xf32> to vector<1x6x16xf32>
    %cst_27 = arith.constant 0.00102838036 : f32
    %95 = vector.broadcast %cst_27 : f32 to vector<1x6x16xf32>
    %96 = arith.mulf %95, %94 : vector<1x6x16xf32>
    %97 = vector.extract_strided_slice %1 {offsets = [0, 1, 0], sizes = [1, 6, 16], strides = [1, 1, 1]} : vector<1x16x16xf32> to vector<1x6x16xf32>
    %cst_28 = arith.constant 0.00759875868 : f32
    %98 = vector.broadcast %cst_28 : f32 to vector<1x6x16xf32>
    %99 = arith.mulf %98, %97 : vector<1x6x16xf32>
    %100 = arith.addf %96, %99 : vector<1x6x16xf32>
    %101 = vector.extract_strided_slice %1 {offsets = [0, 2, 0], sizes = [1, 6, 16], strides = [1, 1, 1]} : vector<1x16x16xf32> to vector<1x6x16xf32>
    %cst_29 = arith.constant 0.0360007733 : f32
    %102 = vector.broadcast %cst_29 : f32 to vector<1x6x16xf32>
    %103 = arith.mulf %102, %101 : vector<1x6x16xf32>
    %104 = arith.addf %100, %103 : vector<1x6x16xf32>
    %105 = vector.extract_strided_slice %1 {offsets = [0, 3, 0], sizes = [1, 6, 16], strides = [1, 1, 1]} : vector<1x16x16xf32> to vector<1x6x16xf32>
    %cst_30 = arith.constant 0.109360702 : f32
    %106 = vector.broadcast %cst_30 : f32 to vector<1x6x16xf32>
    %107 = arith.mulf %106, %105 : vector<1x6x16xf32>
    %108 = arith.addf %104, %107 : vector<1x6x16xf32>
    %109 = vector.extract_strided_slice %1 {offsets = [0, 4, 0], sizes = [1, 6, 16], strides = [1, 1, 1]} : vector<1x16x16xf32> to vector<1x6x16xf32>
    %cst_31 = arith.constant 0.213005543 : f32
    %110 = vector.broadcast %cst_31 : f32 to vector<1x6x16xf32>
    %111 = arith.mulf %110, %109 : vector<1x6x16xf32>
    %112 = arith.addf %108, %111 : vector<1x6x16xf32>
    %113 = vector.extract_strided_slice %1 {offsets = [0, 5, 0], sizes = [1, 6, 16], strides = [1, 1, 1]} : vector<1x16x16xf32> to vector<1x6x16xf32>
    %cst_32 = arith.constant 0.266011745 : f32
    %114 = vector.broadcast %cst_32 : f32 to vector<1x6x16xf32>
    %115 = arith.mulf %114, %113 : vector<1x6x16xf32>
    %116 = arith.addf %112, %115 : vector<1x6x16xf32>
    %117 = vector.extract_strided_slice %1 {offsets = [0, 6, 0], sizes = [1, 6, 16], strides = [1, 1, 1]} : vector<1x16x16xf32> to vector<1x6x16xf32>
    %cst_33 = arith.constant 0.213005543 : f32
    %118 = vector.broadcast %cst_33 : f32 to vector<1x6x16xf32>
    %119 = arith.mulf %118, %117 : vector<1x6x16xf32>
    %120 = arith.addf %116, %119 : vector<1x6x16xf32>
    %121 = vector.extract_strided_slice %1 {offsets = [0, 7, 0], sizes = [1, 6, 16], strides = [1, 1, 1]} : vector<1x16x16xf32> to vector<1x6x16xf32>
    %cst_34 = arith.constant 0.109360702 : f32
    %122 = vector.broadcast %cst_34 : f32 to vector<1x6x16xf32>
    %123 = arith.mulf %122, %121 : vector<1x6x16xf32>
    %124 = arith.addf %120, %123 : vector<1x6x16xf32>
    %125 = vector.extract_strided_slice %1 {offsets = [0, 8, 0], sizes = [1, 6, 16], strides = [1, 1, 1]} : vector<1x16x16xf32> to vector<1x6x16xf32>
    %cst_35 = arith.constant 0.0360007733 : f32
    %126 = vector.broadcast %cst_35 : f32 to vector<1x6x16xf32>
    %127 = arith.mulf %126, %125 : vector<1x6x16xf32>
    %128 = arith.addf %124, %127 : vector<1x6x16xf32>
    %129 = vector.extract_strided_slice %1 {offsets = [0, 9, 0], sizes = [1, 6, 16], strides = [1, 1, 1]} : vector<1x16x16xf32> to vector<1x6x16xf32>
    %cst_36 = arith.constant 0.00759875868 : f32
    %130 = vector.broadcast %cst_36 : f32 to vector<1x6x16xf32>
    %131 = arith.mulf %130, %129 : vector<1x6x16xf32>
    %132 = arith.addf %128, %131 : vector<1x6x16xf32>
    %133 = vector.extract_strided_slice %1 {offsets = [0, 10, 0], sizes = [1, 6, 16], strides = [1, 1, 1]} : vector<1x16x16xf32> to vector<1x6x16xf32>
    %cst_37 = arith.constant 0.00102838036 : f32
    %134 = vector.broadcast %cst_37 : f32 to vector<1x6x16xf32>
    %135 = arith.mulf %134, %133 : vector<1x6x16xf32>
    %136 = arith.addf %132, %135 : vector<1x6x16xf32>
    %137 = vector.extract_strided_slice %136 {offsets = [0, 0, 0], sizes = [1, 6, 6], strides = [1, 1, 1]} : vector<1x6x16xf32> to vector<1x6x6xf32>
    %cst_38 = arith.constant 0.00102838036 : f32
    %138 = vector.broadcast %cst_38 : f32 to vector<1x6x6xf32>
    %139 = arith.mulf %138, %137 : vector<1x6x6xf32>
    %140 = vector.extract_strided_slice %136 {offsets = [0, 0, 1], sizes = [1, 6, 6], strides = [1, 1, 1]} : vector<1x6x16xf32> to vector<1x6x6xf32>
    %cst_39 = arith.constant 0.00759875868 : f32
    %141 = vector.broadcast %cst_39 : f32 to vector<1x6x6xf32>
    %142 = arith.mulf %141, %140 : vector<1x6x6xf32>
    %143 = arith.addf %139, %142 : vector<1x6x6xf32>
    %144 = vector.extract_strided_slice %136 {offsets = [0, 0, 2], sizes = [1, 6, 6], strides = [1, 1, 1]} : vector<1x6x16xf32> to vector<1x6x6xf32>
    %cst_40 = arith.constant 0.0360007733 : f32
    %145 = vector.broadcast %cst_40 : f32 to vector<1x6x6xf32>
    %146 = arith.mulf %145, %144 : vector<1x6x6xf32>
    %147 = arith.addf %143, %146 : vector<1x6x6xf32>
    %148 = vector.extract_strided_slice %136 {offsets = [0, 0, 3], sizes = [1, 6, 6], strides = [1, 1, 1]} : vector<1x6x16xf32> to vector<1x6x6xf32>
    %cst_41 = arith.constant 0.109360702 : f32
    %149 = vector.broadcast %cst_41 : f32 to vector<1x6x6xf32>
    %150 = arith.mulf %149, %148 : vector<1x6x6xf32>
    %151 = arith.addf %147, %150 : vector<1x6x6xf32>
    %152 = vector.extract_strided_slice %136 {offsets = [0, 0, 4], sizes = [1, 6, 6], strides = [1, 1, 1]} : vector<1x6x16xf32> to vector<1x6x6xf32>
    %cst_42 = arith.constant 0.213005543 : f32
    %153 = vector.broadcast %cst_42 : f32 to vector<1x6x6xf32>
    %154 = arith.mulf %153, %152 : vector<1x6x6xf32>
    %155 = arith.addf %151, %154 : vector<1x6x6xf32>
    %156 = vector.extract_strided_slice %136 {offsets = [0, 0, 5], sizes = [1, 6, 6], strides = [1, 1, 1]} : vector<1x6x16xf32> to vector<1x6x6xf32>
    %cst_43 = arith.constant 0.266011745 : f32
    %157 = vector.broadcast %cst_43 : f32 to vector<1x6x6xf32>
    %158 = arith.mulf %157, %156 : vector<1x6x6xf32>
    %159 = arith.addf %155, %158 : vector<1x6x6xf32>
    %160 = vector.extract_strided_slice %136 {offsets = [0, 0, 6], sizes = [1, 6, 6], strides = [1, 1, 1]} : vector<1x6x16xf32> to vector<1x6x6xf32>
    %cst_44 = arith.constant 0.213005543 : f32
    %161 = vector.broadcast %cst_44 : f32 to vector<1x6x6xf32>
    %162 = arith.mulf %161, %160 : vector<1x6x6xf32>
    %163 = arith.addf %159, %162 : vector<1x6x6xf32>
    %164 = vector.extract_strided_slice %136 {offsets = [0, 0, 7], sizes = [1, 6, 6], strides = [1, 1, 1]} : vector<1x6x16xf32> to vector<1x6x6xf32>
    %cst_45 = arith.constant 0.109360702 : f32
    %165 = vector.broadcast %cst_45 : f32 to vector<1x6x6xf32>
    %166 = arith.mulf %165, %164 : vector<1x6x6xf32>
    %167 = arith.addf %163, %166 : vector<1x6x6xf32>
    %168 = vector.extract_strided_slice %136 {offsets = [0, 0, 8], sizes = [1, 6, 6], strides = [1, 1, 1]} : vector<1x6x16xf32> to vector<1x6x6xf32>
    %cst_46 = arith.constant 0.0360007733 : f32
    %169 = vector.broadcast %cst_46 : f32 to vector<1x6x6xf32>
    %170 = arith.mulf %169, %168 : vector<1x6x6xf32>
    %171 = arith.addf %167, %170 : vector<1x6x6xf32>
    %172 = vector.extract_strided_slice %136 {offsets = [0, 0, 9], sizes = [1, 6, 6], strides = [1, 1, 1]} : vector<1x6x16xf32> to vector<1x6x6xf32>
    %cst_47 = arith.constant 0.00759875868 : f32
    %173 = vector.broadcast %cst_47 : f32 to vector<1x6x6xf32>
    %174 = arith.mulf %173, %172 : vector<1x6x6xf32>
    %175 = arith.addf %171, %174 : vector<1x6x6xf32>
    %176 = vector.extract_strided_slice %136 {offsets = [0, 0, 10], sizes = [1, 6, 6], strides = [1, 1, 1]} : vector<1x6x16xf32> to vector<1x6x6xf32>
    %cst_48 = arith.constant 0.00102838036 : f32
    %177 = vector.broadcast %cst_48 : f32 to vector<1x6x6xf32>
    %178 = arith.mulf %177, %176 : vector<1x6x6xf32>
    %179 = arith.addf %175, %178 : vector<1x6x6xf32>
    %180 = arith.mulf %0, %0 : vector<1x16x16xf32>
    %181 = vector.extract_strided_slice %180 {offsets = [0, 0, 0], sizes = [1, 6, 16], strides = [1, 1, 1]} : vector<1x16x16xf32> to vector<1x6x16xf32>
    %cst_49 = arith.constant 0.00102838036 : f32
    %182 = vector.broadcast %cst_49 : f32 to vector<1x6x16xf32>
    %183 = arith.mulf %182, %181 : vector<1x6x16xf32>
    %184 = vector.extract_strided_slice %180 {offsets = [0, 1, 0], sizes = [1, 6, 16], strides = [1, 1, 1]} : vector<1x16x16xf32> to vector<1x6x16xf32>
    %cst_50 = arith.constant 0.00759875868 : f32
    %185 = vector.broadcast %cst_50 : f32 to vector<1x6x16xf32>
    %186 = arith.mulf %185, %184 : vector<1x6x16xf32>
    %187 = arith.addf %183, %186 : vector<1x6x16xf32>
    %188 = vector.extract_strided_slice %180 {offsets = [0, 2, 0], sizes = [1, 6, 16], strides = [1, 1, 1]} : vector<1x16x16xf32> to vector<1x6x16xf32>
    %cst_51 = arith.constant 0.0360007733 : f32
    %189 = vector.broadcast %cst_51 : f32 to vector<1x6x16xf32>
    %190 = arith.mulf %189, %188 : vector<1x6x16xf32>
    %191 = arith.addf %187, %190 : vector<1x6x16xf32>
    %192 = vector.extract_strided_slice %180 {offsets = [0, 3, 0], sizes = [1, 6, 16], strides = [1, 1, 1]} : vector<1x16x16xf32> to vector<1x6x16xf32>
    %cst_52 = arith.constant 0.109360702 : f32
    %193 = vector.broadcast %cst_52 : f32 to vector<1x6x16xf32>
    %194 = arith.mulf %193, %192 : vector<1x6x16xf32>
    %195 = arith.addf %191, %194 : vector<1x6x16xf32>
    %196 = vector.extract_strided_slice %180 {offsets = [0, 4, 0], sizes = [1, 6, 16], strides = [1, 1, 1]} : vector<1x16x16xf32> to vector<1x6x16xf32>
    %cst_53 = arith.constant 0.213005543 : f32
    %197 = vector.broadcast %cst_53 : f32 to vector<1x6x16xf32>
    %198 = arith.mulf %197, %196 : vector<1x6x16xf32>
    %199 = arith.addf %195, %198 : vector<1x6x16xf32>
    %200 = vector.extract_strided_slice %180 {offsets = [0, 5, 0], sizes = [1, 6, 16], strides = [1, 1, 1]} : vector<1x16x16xf32> to vector<1x6x16xf32>
    %cst_54 = arith.constant 0.266011745 : f32
    %201 = vector.broadcast %cst_54 : f32 to vector<1x6x16xf32>
    %202 = arith.mulf %201, %200 : vector<1x6x16xf32>
    %203 = arith.addf %199, %202 : vector<1x6x16xf32>
    %204 = vector.extract_strided_slice %180 {offsets = [0, 6, 0], sizes = [1, 6, 16], strides = [1, 1, 1]} : vector<1x16x16xf32> to vector<1x6x16xf32>
    %cst_55 = arith.constant 0.213005543 : f32
    %205 = vector.broadcast %cst_55 : f32 to vector<1x6x16xf32>
    %206 = arith.mulf %205, %204 : vector<1x6x16xf32>
    %207 = arith.addf %203, %206 : vector<1x6x16xf32>
    %208 = vector.extract_strided_slice %180 {offsets = [0, 7, 0], sizes = [1, 6, 16], strides = [1, 1, 1]} : vector<1x16x16xf32> to vector<1x6x16xf32>
    %cst_56 = arith.constant 0.109360702 : f32
    %209 = vector.broadcast %cst_56 : f32 to vector<1x6x16xf32>
    %210 = arith.mulf %209, %208 : vector<1x6x16xf32>
    %211 = arith.addf %207, %210 : vector<1x6x16xf32>
    %212 = vector.extract_strided_slice %180 {offsets = [0, 8, 0], sizes = [1, 6, 16], strides = [1, 1, 1]} : vector<1x16x16xf32> to vector<1x6x16xf32>
    %cst_57 = arith.constant 0.0360007733 : f32
    %213 = vector.broadcast %cst_57 : f32 to vector<1x6x16xf32>
    %214 = arith.mulf %213, %212 : vector<1x6x16xf32>
    %215 = arith.addf %211, %214 : vector<1x6x16xf32>
    %216 = vector.extract_strided_slice %180 {offsets = [0, 9, 0], sizes = [1, 6, 16], strides = [1, 1, 1]} : vector<1x16x16xf32> to vector<1x6x16xf32>
    %cst_58 = arith.constant 0.00759875868 : f32
    %217 = vector.broadcast %cst_58 : f32 to vector<1x6x16xf32>
    %218 = arith.mulf %217, %216 : vector<1x6x16xf32>
    %219 = arith.addf %215, %218 : vector<1x6x16xf32>
    %220 = vector.extract_strided_slice %180 {offsets = [0, 10, 0], sizes = [1, 6, 16], strides = [1, 1, 1]} : vector<1x16x16xf32> to vector<1x6x16xf32>
    %cst_59 = arith.constant 0.00102838036 : f32
    %221 = vector.broadcast %cst_59 : f32 to vector<1x6x16xf32>
    %222 = arith.mulf %221, %220 : vector<1x6x16xf32>
    %223 = arith.addf %219, %222 : vector<1x6x16xf32>
    %224 = vector.extract_strided_slice %223 {offsets = [0, 0, 0], sizes = [1, 6, 6], strides = [1, 1, 1]} : vector<1x6x16xf32> to vector<1x6x6xf32>
    %cst_60 = arith.constant 0.00102838036 : f32
    %225 = vector.broadcast %cst_60 : f32 to vector<1x6x6xf32>
    %226 = arith.mulf %225, %224 : vector<1x6x6xf32>
    %227 = vector.extract_strided_slice %223 {offsets = [0, 0, 1], sizes = [1, 6, 6], strides = [1, 1, 1]} : vector<1x6x16xf32> to vector<1x6x6xf32>
    %cst_61 = arith.constant 0.00759875868 : f32
    %228 = vector.broadcast %cst_61 : f32 to vector<1x6x6xf32>
    %229 = arith.mulf %228, %227 : vector<1x6x6xf32>
    %230 = arith.addf %226, %229 : vector<1x6x6xf32>
    %231 = vector.extract_strided_slice %223 {offsets = [0, 0, 2], sizes = [1, 6, 6], strides = [1, 1, 1]} : vector<1x6x16xf32> to vector<1x6x6xf32>
    %cst_62 = arith.constant 0.0360007733 : f32
    %232 = vector.broadcast %cst_62 : f32 to vector<1x6x6xf32>
    %233 = arith.mulf %232, %231 : vector<1x6x6xf32>
    %234 = arith.addf %230, %233 : vector<1x6x6xf32>
    %235 = vector.extract_strided_slice %223 {offsets = [0, 0, 3], sizes = [1, 6, 6], strides = [1, 1, 1]} : vector<1x6x16xf32> to vector<1x6x6xf32>
    %cst_63 = arith.constant 0.109360702 : f32
    %236 = vector.broadcast %cst_63 : f32 to vector<1x6x6xf32>
    %237 = arith.mulf %236, %235 : vector<1x6x6xf32>
    %238 = arith.addf %234, %237 : vector<1x6x6xf32>
    %239 = vector.extract_strided_slice %223 {offsets = [0, 0, 4], sizes = [1, 6, 6], strides = [1, 1, 1]} : vector<1x6x16xf32> to vector<1x6x6xf32>
    %cst_64 = arith.constant 0.213005543 : f32
    %240 = vector.broadcast %cst_64 : f32 to vector<1x6x6xf32>
    %241 = arith.mulf %240, %239 : vector<1x6x6xf32>
    %242 = arith.addf %238, %241 : vector<1x6x6xf32>
    %243 = vector.extract_strided_slice %223 {offsets = [0, 0, 5], sizes = [1, 6, 6], strides = [1, 1, 1]} : vector<1x6x16xf32> to vector<1x6x6xf32>
    %cst_65 = arith.constant 0.266011745 : f32
    %244 = vector.broadcast %cst_65 : f32 to vector<1x6x6xf32>
    %245 = arith.mulf %244, %243 : vector<1x6x6xf32>
    %246 = arith.addf %242, %245 : vector<1x6x6xf32>
    %247 = vector.extract_strided_slice %223 {offsets = [0, 0, 6], sizes = [1, 6, 6], strides = [1, 1, 1]} : vector<1x6x16xf32> to vector<1x6x6xf32>
    %cst_66 = arith.constant 0.213005543 : f32
    %248 = vector.broadcast %cst_66 : f32 to vector<1x6x6xf32>
    %249 = arith.mulf %248, %247 : vector<1x6x6xf32>
    %250 = arith.addf %246, %249 : vector<1x6x6xf32>
    %251 = vector.extract_strided_slice %223 {offsets = [0, 0, 7], sizes = [1, 6, 6], strides = [1, 1, 1]} : vector<1x6x16xf32> to vector<1x6x6xf32>
    %cst_67 = arith.constant 0.109360702 : f32
    %252 = vector.broadcast %cst_67 : f32 to vector<1x6x6xf32>
    %253 = arith.mulf %252, %251 : vector<1x6x6xf32>
    %254 = arith.addf %250, %253 : vector<1x6x6xf32>
    %255 = vector.extract_strided_slice %223 {offsets = [0, 0, 8], sizes = [1, 6, 6], strides = [1, 1, 1]} : vector<1x6x16xf32> to vector<1x6x6xf32>
    %cst_68 = arith.constant 0.0360007733 : f32
    %256 = vector.broadcast %cst_68 : f32 to vector<1x6x6xf32>
    %257 = arith.mulf %256, %255 : vector<1x6x6xf32>
    %258 = arith.addf %254, %257 : vector<1x6x6xf32>
    %259 = vector.extract_strided_slice %223 {offsets = [0, 0, 9], sizes = [1, 6, 6], strides = [1, 1, 1]} : vector<1x6x16xf32> to vector<1x6x6xf32>
    %cst_69 = arith.constant 0.00759875868 : f32
    %260 = vector.broadcast %cst_69 : f32 to vector<1x6x6xf32>
    %261 = arith.mulf %260, %259 : vector<1x6x6xf32>
    %262 = arith.addf %258, %261 : vector<1x6x6xf32>
    %263 = vector.extract_strided_slice %223 {offsets = [0, 0, 10], sizes = [1, 6, 6], strides = [1, 1, 1]} : vector<1x6x16xf32> to vector<1x6x6xf32>
    %cst_70 = arith.constant 0.00102838036 : f32
    %264 = vector.broadcast %cst_70 : f32 to vector<1x6x6xf32>
    %265 = arith.mulf %264, %263 : vector<1x6x6xf32>
    %266 = arith.addf %262, %265 : vector<1x6x6xf32>
    %267 = arith.mulf %1, %1 : vector<1x16x16xf32>
    %268 = vector.extract_strided_slice %267 {offsets = [0, 0, 0], sizes = [1, 6, 16], strides = [1, 1, 1]} : vector<1x16x16xf32> to vector<1x6x16xf32>
    %cst_71 = arith.constant 0.00102838036 : f32
    %269 = vector.broadcast %cst_71 : f32 to vector<1x6x16xf32>
    %270 = arith.mulf %269, %268 : vector<1x6x16xf32>
    %271 = vector.extract_strided_slice %267 {offsets = [0, 1, 0], sizes = [1, 6, 16], strides = [1, 1, 1]} : vector<1x16x16xf32> to vector<1x6x16xf32>
    %cst_72 = arith.constant 0.00759875868 : f32
    %272 = vector.broadcast %cst_72 : f32 to vector<1x6x16xf32>
    %273 = arith.mulf %272, %271 : vector<1x6x16xf32>
    %274 = arith.addf %270, %273 : vector<1x6x16xf32>
    %275 = vector.extract_strided_slice %267 {offsets = [0, 2, 0], sizes = [1, 6, 16], strides = [1, 1, 1]} : vector<1x16x16xf32> to vector<1x6x16xf32>
    %cst_73 = arith.constant 0.0360007733 : f32
    %276 = vector.broadcast %cst_73 : f32 to vector<1x6x16xf32>
    %277 = arith.mulf %276, %275 : vector<1x6x16xf32>
    %278 = arith.addf %274, %277 : vector<1x6x16xf32>
    %279 = vector.extract_strided_slice %267 {offsets = [0, 3, 0], sizes = [1, 6, 16], strides = [1, 1, 1]} : vector<1x16x16xf32> to vector<1x6x16xf32>
    %cst_74 = arith.constant 0.109360702 : f32
    %280 = vector.broadcast %cst_74 : f32 to vector<1x6x16xf32>
    %281 = arith.mulf %280, %279 : vector<1x6x16xf32>
    %282 = arith.addf %278, %281 : vector<1x6x16xf32>
    %283 = vector.extract_strided_slice %267 {offsets = [0, 4, 0], sizes = [1, 6, 16], strides = [1, 1, 1]} : vector<1x16x16xf32> to vector<1x6x16xf32>
    %cst_75 = arith.constant 0.213005543 : f32
    %284 = vector.broadcast %cst_75 : f32 to vector<1x6x16xf32>
    %285 = arith.mulf %284, %283 : vector<1x6x16xf32>
    %286 = arith.addf %282, %285 : vector<1x6x16xf32>
    %287 = vector.extract_strided_slice %267 {offsets = [0, 5, 0], sizes = [1, 6, 16], strides = [1, 1, 1]} : vector<1x16x16xf32> to vector<1x6x16xf32>
    %cst_76 = arith.constant 0.266011745 : f32
    %288 = vector.broadcast %cst_76 : f32 to vector<1x6x16xf32>
    %289 = arith.mulf %288, %287 : vector<1x6x16xf32>
    %290 = arith.addf %286, %289 : vector<1x6x16xf32>
    %291 = vector.extract_strided_slice %267 {offsets = [0, 6, 0], sizes = [1, 6, 16], strides = [1, 1, 1]} : vector<1x16x16xf32> to vector<1x6x16xf32>
    %cst_77 = arith.constant 0.213005543 : f32
    %292 = vector.broadcast %cst_77 : f32 to vector<1x6x16xf32>
    %293 = arith.mulf %292, %291 : vector<1x6x16xf32>
    %294 = arith.addf %290, %293 : vector<1x6x16xf32>
    %295 = vector.extract_strided_slice %267 {offsets = [0, 7, 0], sizes = [1, 6, 16], strides = [1, 1, 1]} : vector<1x16x16xf32> to vector<1x6x16xf32>
    %cst_78 = arith.constant 0.109360702 : f32
    %296 = vector.broadcast %cst_78 : f32 to vector<1x6x16xf32>
    %297 = arith.mulf %296, %295 : vector<1x6x16xf32>
    %298 = arith.addf %294, %297 : vector<1x6x16xf32>
    %299 = vector.extract_strided_slice %267 {offsets = [0, 8, 0], sizes = [1, 6, 16], strides = [1, 1, 1]} : vector<1x16x16xf32> to vector<1x6x16xf32>
    %cst_79 = arith.constant 0.0360007733 : f32
    %300 = vector.broadcast %cst_79 : f32 to vector<1x6x16xf32>
    %301 = arith.mulf %300, %299 : vector<1x6x16xf32>
    %302 = arith.addf %298, %301 : vector<1x6x16xf32>
    %303 = vector.extract_strided_slice %267 {offsets = [0, 9, 0], sizes = [1, 6, 16], strides = [1, 1, 1]} : vector<1x16x16xf32> to vector<1x6x16xf32>
    %cst_80 = arith.constant 0.00759875868 : f32
    %304 = vector.broadcast %cst_80 : f32 to vector<1x6x16xf32>
    %305 = arith.mulf %304, %303 : vector<1x6x16xf32>
    %306 = arith.addf %302, %305 : vector<1x6x16xf32>
    %307 = vector.extract_strided_slice %267 {offsets = [0, 10, 0], sizes = [1, 6, 16], strides = [1, 1, 1]} : vector<1x16x16xf32> to vector<1x6x16xf32>
    %cst_81 = arith.constant 0.00102838036 : f32
    %308 = vector.broadcast %cst_81 : f32 to vector<1x6x16xf32>
    %309 = arith.mulf %308, %307 : vector<1x6x16xf32>
    %310 = arith.addf %306, %309 : vector<1x6x16xf32>
    %311 = vector.extract_strided_slice %310 {offsets = [0, 0, 0], sizes = [1, 6, 6], strides = [1, 1, 1]} : vector<1x6x16xf32> to vector<1x6x6xf32>
    %cst_82 = arith.constant 0.00102838036 : f32
    %312 = vector.broadcast %cst_82 : f32 to vector<1x6x6xf32>
    %313 = arith.mulf %312, %311 : vector<1x6x6xf32>
    %314 = vector.extract_strided_slice %310 {offsets = [0, 0, 1], sizes = [1, 6, 6], strides = [1, 1, 1]} : vector<1x6x16xf32> to vector<1x6x6xf32>
    %cst_83 = arith.constant 0.00759875868 : f32
    %315 = vector.broadcast %cst_83 : f32 to vector<1x6x6xf32>
    %316 = arith.mulf %315, %314 : vector<1x6x6xf32>
    %317 = arith.addf %313, %316 : vector<1x6x6xf32>
    %318 = vector.extract_strided_slice %310 {offsets = [0, 0, 2], sizes = [1, 6, 6], strides = [1, 1, 1]} : vector<1x6x16xf32> to vector<1x6x6xf32>
    %cst_84 = arith.constant 0.0360007733 : f32
    %319 = vector.broadcast %cst_84 : f32 to vector<1x6x6xf32>
    %320 = arith.mulf %319, %318 : vector<1x6x6xf32>
    %321 = arith.addf %317, %320 : vector<1x6x6xf32>
    %322 = vector.extract_strided_slice %310 {offsets = [0, 0, 3], sizes = [1, 6, 6], strides = [1, 1, 1]} : vector<1x6x16xf32> to vector<1x6x6xf32>
    %cst_85 = arith.constant 0.109360702 : f32
    %323 = vector.broadcast %cst_85 : f32 to vector<1x6x6xf32>
    %324 = arith.mulf %323, %322 : vector<1x6x6xf32>
    %325 = arith.addf %321, %324 : vector<1x6x6xf32>
    %326 = vector.extract_strided_slice %310 {offsets = [0, 0, 4], sizes = [1, 6, 6], strides = [1, 1, 1]} : vector<1x6x16xf32> to vector<1x6x6xf32>
    %cst_86 = arith.constant 0.213005543 : f32
    %327 = vector.broadcast %cst_86 : f32 to vector<1x6x6xf32>
    %328 = arith.mulf %327, %326 : vector<1x6x6xf32>
    %329 = arith.addf %325, %328 : vector<1x6x6xf32>
    %330 = vector.extract_strided_slice %310 {offsets = [0, 0, 5], sizes = [1, 6, 6], strides = [1, 1, 1]} : vector<1x6x16xf32> to vector<1x6x6xf32>
    %cst_87 = arith.constant 0.266011745 : f32
    %331 = vector.broadcast %cst_87 : f32 to vector<1x6x6xf32>
    %332 = arith.mulf %331, %330 : vector<1x6x6xf32>
    %333 = arith.addf %329, %332 : vector<1x6x6xf32>
    %334 = vector.extract_strided_slice %310 {offsets = [0, 0, 6], sizes = [1, 6, 6], strides = [1, 1, 1]} : vector<1x6x16xf32> to vector<1x6x6xf32>
    %cst_88 = arith.constant 0.213005543 : f32
    %335 = vector.broadcast %cst_88 : f32 to vector<1x6x6xf32>
    %336 = arith.mulf %335, %334 : vector<1x6x6xf32>
    %337 = arith.addf %333, %336 : vector<1x6x6xf32>
    %338 = vector.extract_strided_slice %310 {offsets = [0, 0, 7], sizes = [1, 6, 6], strides = [1, 1, 1]} : vector<1x6x16xf32> to vector<1x6x6xf32>
    %cst_89 = arith.constant 0.109360702 : f32
    %339 = vector.broadcast %cst_89 : f32 to vector<1x6x6xf32>
    %340 = arith.mulf %339, %338 : vector<1x6x6xf32>
    %341 = arith.addf %337, %340 : vector<1x6x6xf32>
    %342 = vector.extract_strided_slice %310 {offsets = [0, 0, 8], sizes = [1, 6, 6], strides = [1, 1, 1]} : vector<1x6x16xf32> to vector<1x6x6xf32>
    %cst_90 = arith.constant 0.0360007733 : f32
    %343 = vector.broadcast %cst_90 : f32 to vector<1x6x6xf32>
    %344 = arith.mulf %343, %342 : vector<1x6x6xf32>
    %345 = arith.addf %341, %344 : vector<1x6x6xf32>
    %346 = vector.extract_strided_slice %310 {offsets = [0, 0, 9], sizes = [1, 6, 6], strides = [1, 1, 1]} : vector<1x6x16xf32> to vector<1x6x6xf32>
    %cst_91 = arith.constant 0.00759875868 : f32
    %347 = vector.broadcast %cst_91 : f32 to vector<1x6x6xf32>
    %348 = arith.mulf %347, %346 : vector<1x6x6xf32>
    %349 = arith.addf %345, %348 : vector<1x6x6xf32>
    %350 = vector.extract_strided_slice %310 {offsets = [0, 0, 10], sizes = [1, 6, 6], strides = [1, 1, 1]} : vector<1x6x16xf32> to vector<1x6x6xf32>
    %cst_92 = arith.constant 0.00102838036 : f32
    %351 = vector.broadcast %cst_92 : f32 to vector<1x6x6xf32>
    %352 = arith.mulf %351, %350 : vector<1x6x6xf32>
    %353 = arith.addf %349, %352 : vector<1x6x6xf32>
    %354 = arith.mulf %0, %1 : vector<1x16x16xf32>
    %355 = vector.extract_strided_slice %354 {offsets = [0, 0, 0], sizes = [1, 6, 16], strides = [1, 1, 1]} : vector<1x16x16xf32> to vector<1x6x16xf32>
    %cst_93 = arith.constant 0.00102838036 : f32
    %356 = vector.broadcast %cst_93 : f32 to vector<1x6x16xf32>
    %357 = arith.mulf %356, %355 : vector<1x6x16xf32>
    %358 = vector.extract_strided_slice %354 {offsets = [0, 1, 0], sizes = [1, 6, 16], strides = [1, 1, 1]} : vector<1x16x16xf32> to vector<1x6x16xf32>
    %cst_94 = arith.constant 0.00759875868 : f32
    %359 = vector.broadcast %cst_94 : f32 to vector<1x6x16xf32>
    %360 = arith.mulf %359, %358 : vector<1x6x16xf32>
    %361 = arith.addf %357, %360 : vector<1x6x16xf32>
    %362 = vector.extract_strided_slice %354 {offsets = [0, 2, 0], sizes = [1, 6, 16], strides = [1, 1, 1]} : vector<1x16x16xf32> to vector<1x6x16xf32>
    %cst_95 = arith.constant 0.0360007733 : f32
    %363 = vector.broadcast %cst_95 : f32 to vector<1x6x16xf32>
    %364 = arith.mulf %363, %362 : vector<1x6x16xf32>
    %365 = arith.addf %361, %364 : vector<1x6x16xf32>
    %366 = vector.extract_strided_slice %354 {offsets = [0, 3, 0], sizes = [1, 6, 16], strides = [1, 1, 1]} : vector<1x16x16xf32> to vector<1x6x16xf32>
    %cst_96 = arith.constant 0.109360702 : f32
    %367 = vector.broadcast %cst_96 : f32 to vector<1x6x16xf32>
    %368 = arith.mulf %367, %366 : vector<1x6x16xf32>
    %369 = arith.addf %365, %368 : vector<1x6x16xf32>
    %370 = vector.extract_strided_slice %354 {offsets = [0, 4, 0], sizes = [1, 6, 16], strides = [1, 1, 1]} : vector<1x16x16xf32> to vector<1x6x16xf32>
    %cst_97 = arith.constant 0.213005543 : f32
    %371 = vector.broadcast %cst_97 : f32 to vector<1x6x16xf32>
    %372 = arith.mulf %371, %370 : vector<1x6x16xf32>
    %373 = arith.addf %369, %372 : vector<1x6x16xf32>
    %374 = vector.extract_strided_slice %354 {offsets = [0, 5, 0], sizes = [1, 6, 16], strides = [1, 1, 1]} : vector<1x16x16xf32> to vector<1x6x16xf32>
    %cst_98 = arith.constant 0.266011745 : f32
    %375 = vector.broadcast %cst_98 : f32 to vector<1x6x16xf32>
    %376 = arith.mulf %375, %374 : vector<1x6x16xf32>
    %377 = arith.addf %373, %376 : vector<1x6x16xf32>
    %378 = vector.extract_strided_slice %354 {offsets = [0, 6, 0], sizes = [1, 6, 16], strides = [1, 1, 1]} : vector<1x16x16xf32> to vector<1x6x16xf32>
    %cst_99 = arith.constant 0.213005543 : f32
    %379 = vector.broadcast %cst_99 : f32 to vector<1x6x16xf32>
    %380 = arith.mulf %379, %378 : vector<1x6x16xf32>
    %381 = arith.addf %377, %380 : vector<1x6x16xf32>
    %382 = vector.extract_strided_slice %354 {offsets = [0, 7, 0], sizes = [1, 6, 16], strides = [1, 1, 1]} : vector<1x16x16xf32> to vector<1x6x16xf32>
    %cst_100 = arith.constant 0.109360702 : f32
    %383 = vector.broadcast %cst_100 : f32 to vector<1x6x16xf32>
    %384 = arith.mulf %383, %382 : vector<1x6x16xf32>
    %385 = arith.addf %381, %384 : vector<1x6x16xf32>
    %386 = vector.extract_strided_slice %354 {offsets = [0, 8, 0], sizes = [1, 6, 16], strides = [1, 1, 1]} : vector<1x16x16xf32> to vector<1x6x16xf32>
    %cst_101 = arith.constant 0.0360007733 : f32
    %387 = vector.broadcast %cst_101 : f32 to vector<1x6x16xf32>
    %388 = arith.mulf %387, %386 : vector<1x6x16xf32>
    %389 = arith.addf %385, %388 : vector<1x6x16xf32>
    %390 = vector.extract_strided_slice %354 {offsets = [0, 9, 0], sizes = [1, 6, 16], strides = [1, 1, 1]} : vector<1x16x16xf32> to vector<1x6x16xf32>
    %cst_102 = arith.constant 0.00759875868 : f32
    %391 = vector.broadcast %cst_102 : f32 to vector<1x6x16xf32>
    %392 = arith.mulf %391, %390 : vector<1x6x16xf32>
    %393 = arith.addf %389, %392 : vector<1x6x16xf32>
    %394 = vector.extract_strided_slice %354 {offsets = [0, 10, 0], sizes = [1, 6, 16], strides = [1, 1, 1]} : vector<1x16x16xf32> to vector<1x6x16xf32>
    %cst_103 = arith.constant 0.00102838036 : f32
    %395 = vector.broadcast %cst_103 : f32 to vector<1x6x16xf32>
    %396 = arith.mulf %395, %394 : vector<1x6x16xf32>
    %397 = arith.addf %393, %396 : vector<1x6x16xf32>
    %398 = vector.extract_strided_slice %397 {offsets = [0, 0, 0], sizes = [1, 6, 6], strides = [1, 1, 1]} : vector<1x6x16xf32> to vector<1x6x6xf32>
    %cst_104 = arith.constant 0.00102838036 : f32
    %399 = vector.broadcast %cst_104 : f32 to vector<1x6x6xf32>
    %400 = arith.mulf %399, %398 : vector<1x6x6xf32>
    %401 = vector.extract_strided_slice %397 {offsets = [0, 0, 1], sizes = [1, 6, 6], strides = [1, 1, 1]} : vector<1x6x16xf32> to vector<1x6x6xf32>
    %cst_105 = arith.constant 0.00759875868 : f32
    %402 = vector.broadcast %cst_105 : f32 to vector<1x6x6xf32>
    %403 = arith.mulf %402, %401 : vector<1x6x6xf32>
    %404 = arith.addf %400, %403 : vector<1x6x6xf32>
    %405 = vector.extract_strided_slice %397 {offsets = [0, 0, 2], sizes = [1, 6, 6], strides = [1, 1, 1]} : vector<1x6x16xf32> to vector<1x6x6xf32>
    %cst_106 = arith.constant 0.0360007733 : f32
    %406 = vector.broadcast %cst_106 : f32 to vector<1x6x6xf32>
    %407 = arith.mulf %406, %405 : vector<1x6x6xf32>
    %408 = arith.addf %404, %407 : vector<1x6x6xf32>
    %409 = vector.extract_strided_slice %397 {offsets = [0, 0, 3], sizes = [1, 6, 6], strides = [1, 1, 1]} : vector<1x6x16xf32> to vector<1x6x6xf32>
    %cst_107 = arith.constant 0.109360702 : f32
    %410 = vector.broadcast %cst_107 : f32 to vector<1x6x6xf32>
    %411 = arith.mulf %410, %409 : vector<1x6x6xf32>
    %412 = arith.addf %408, %411 : vector<1x6x6xf32>
    %413 = vector.extract_strided_slice %397 {offsets = [0, 0, 4], sizes = [1, 6, 6], strides = [1, 1, 1]} : vector<1x6x16xf32> to vector<1x6x6xf32>
    %cst_108 = arith.constant 0.213005543 : f32
    %414 = vector.broadcast %cst_108 : f32 to vector<1x6x6xf32>
    %415 = arith.mulf %414, %413 : vector<1x6x6xf32>
    %416 = arith.addf %412, %415 : vector<1x6x6xf32>
    %417 = vector.extract_strided_slice %397 {offsets = [0, 0, 5], sizes = [1, 6, 6], strides = [1, 1, 1]} : vector<1x6x16xf32> to vector<1x6x6xf32>
    %cst_109 = arith.constant 0.266011745 : f32
    %418 = vector.broadcast %cst_109 : f32 to vector<1x6x6xf32>
    %419 = arith.mulf %418, %417 : vector<1x6x6xf32>
    %420 = arith.addf %416, %419 : vector<1x6x6xf32>
    %421 = vector.extract_strided_slice %397 {offsets = [0, 0, 6], sizes = [1, 6, 6], strides = [1, 1, 1]} : vector<1x6x16xf32> to vector<1x6x6xf32>
    %cst_110 = arith.constant 0.213005543 : f32
    %422 = vector.broadcast %cst_110 : f32 to vector<1x6x6xf32>
    %423 = arith.mulf %422, %421 : vector<1x6x6xf32>
    %424 = arith.addf %420, %423 : vector<1x6x6xf32>
    %425 = vector.extract_strided_slice %397 {offsets = [0, 0, 7], sizes = [1, 6, 6], strides = [1, 1, 1]} : vector<1x6x16xf32> to vector<1x6x6xf32>
    %cst_111 = arith.constant 0.109360702 : f32
    %426 = vector.broadcast %cst_111 : f32 to vector<1x6x6xf32>
    %427 = arith.mulf %426, %425 : vector<1x6x6xf32>
    %428 = arith.addf %424, %427 : vector<1x6x6xf32>
    %429 = vector.extract_strided_slice %397 {offsets = [0, 0, 8], sizes = [1, 6, 6], strides = [1, 1, 1]} : vector<1x6x16xf32> to vector<1x6x6xf32>
    %cst_112 = arith.constant 0.0360007733 : f32
    %430 = vector.broadcast %cst_112 : f32 to vector<1x6x6xf32>
    %431 = arith.mulf %430, %429 : vector<1x6x6xf32>
    %432 = arith.addf %428, %431 : vector<1x6x6xf32>
    %433 = vector.extract_strided_slice %397 {offsets = [0, 0, 9], sizes = [1, 6, 6], strides = [1, 1, 1]} : vector<1x6x16xf32> to vector<1x6x6xf32>
    %cst_113 = arith.constant 0.00759875868 : f32
    %434 = vector.broadcast %cst_113 : f32 to vector<1x6x6xf32>
    %435 = arith.mulf %434, %433 : vector<1x6x6xf32>
    %436 = arith.addf %432, %435 : vector<1x6x6xf32>
    %437 = vector.extract_strided_slice %397 {offsets = [0, 0, 10], sizes = [1, 6, 6], strides = [1, 1, 1]} : vector<1x6x16xf32> to vector<1x6x6xf32>
    %cst_114 = arith.constant 0.00102838036 : f32
    %438 = vector.broadcast %cst_114 : f32 to vector<1x6x6xf32>
    %439 = arith.mulf %438, %437 : vector<1x6x6xf32>
    %440 = arith.addf %436, %439 : vector<1x6x6xf32>
    %441 = arith.mulf %93, %179 : vector<1x6x6xf32>
    %442 = arith.mulf %93, %93 : vector<1x6x6xf32>
    %443 = arith.mulf %179, %179 : vector<1x6x6xf32>
    %cst_115 = arith.constant 2.000000e+00 : f32
    %444 = vector.broadcast %cst_115 : f32 to vector<1x6x6xf32>
    %445 = arith.mulf %444, %441 : vector<1x6x6xf32>
    %cst_116 = arith.constant 9.99999974E-5 : f32
    %446 = vector.broadcast %cst_116 : f32 to vector<1x6x6xf32>
    %447 = arith.addf %445, %446 : vector<1x6x6xf32>
    %448 = arith.subf %440, %441 : vector<1x6x6xf32>
    %cst_117 = arith.constant 2.000000e+00 : f32
    %449 = vector.broadcast %cst_117 : f32 to vector<1x6x6xf32>
    %450 = arith.mulf %449, %448 : vector<1x6x6xf32>
    %cst_118 = arith.constant 8.99999984E-4 : f32
    %451 = vector.broadcast %cst_118 : f32 to vector<1x6x6xf32>
    %452 = arith.addf %450, %451 : vector<1x6x6xf32>
    %453 = arith.mulf %447, %452 : vector<1x6x6xf32>
    %454 = arith.addf %442, %443 : vector<1x6x6xf32>
    %cst_119 = arith.constant 9.99999974E-5 : f32
    %455 = vector.broadcast %cst_119 : f32 to vector<1x6x6xf32>
    %456 = arith.addf %454, %455 : vector<1x6x6xf32>
    %457 = arith.subf %266, %442 : vector<1x6x6xf32>
    %458 = arith.subf %353, %443 : vector<1x6x6xf32>
    %459 = arith.addf %457, %458 : vector<1x6x6xf32>
    %cst_120 = arith.constant 8.99999984E-4 : f32
    %460 = vector.broadcast %cst_120 : f32 to vector<1x6x6xf32>
    %461 = arith.addf %459, %460 : vector<1x6x6xf32>
    %462 = arith.mulf %456, %461 : vector<1x6x6xf32>
    %463 = arith.divf %453, %462 : vector<1x6x6xf32>
    %464 = vector.shape_cast %463 : vector<1x6x6xf32> to vector<1x1x6x6xf32>
    %cst_121 = arith.constant dense<0.000000e+00> : vector<1xf32>
    %465 = vector.multi_reduction <add>, %464, %cst_121 [1, 2, 3] : vector<1x1x6x6xf32> to vector<1xf32>
    %466 = vector.shape_cast %465 : vector<1xf32> to vector<1x1x1x1xf32>
    %467 = vector.extract %466[0, 0, 0, 0] : f32 from vector<1x1x1x1xf32>
    %468 = tpu.iota {dimensions = array<i32: 0>} : vector<8x128xi32>
    %469 = tpu.iota {dimensions = array<i32: 1>} : vector<8x128xi32>
    %c0_i32 = arith.constant 0 : i32
    %470 = vector.broadcast %c0_i32 : i32 to vector<8x128xi32>
    %471 = arith.cmpi eq, %468, %470 : vector<8x128xi32>
    %c0_i32_122 = arith.constant 0 : i32
    %472 = vector.broadcast %c0_i32_122 : i32 to vector<8x128xi32>
    %473 = arith.cmpi eq, %469, %472 : vector<8x128xi32>
    %474 = arith.andi %471, %473 : vector<8x128xi1>
    %cst_123 = arith.constant 0.000000e+00 : f32
    %475 = vector.broadcast %7 : f32 to vector<8x128xf32>
    %476 = vector.broadcast %cst_123 : f32 to vector<8x128xf32>
    %477 = arith.select %474, %475, %476 : vector<8x128xi1>, vector<8x128xf32>
    %c0_i32_124 = arith.constant 0 : i32
    %478 = vector.broadcast %c0_i32_124 : i32 to vector<8x128xi32>
    %479 = arith.cmpi eq, %468, %478 : vector<8x128xi32>
    %c1_i32 = arith.constant 1 : i32
    %480 = vector.broadcast %c1_i32 : i32 to vector<8x128xi32>
    %481 = arith.cmpi eq, %469, %480 : vector<8x128xi32>
    %482 = arith.andi %479, %481 : vector<8x128xi1>
    %cst_125 = arith.constant 0.000000e+00 : f32
    %483 = vector.broadcast %467 : f32 to vector<8x128xf32>
    %484 = vector.broadcast %cst_125 : f32 to vector<8x128xf32>
    %485 = arith.select %482, %483, %484 : vector<8x128xi1>, vector<8x128xf32>
    %486 = arith.addf %477, %485 : vector<8x128xf32>
    %c0_126 = arith.constant 0 : index
    %c0_127 = arith.constant 0 : index
    %487 = vector.load %arg3[%c0_126, %c0_127] : memref<8x128xf32, #tpu.memory_space<vmem>>, vector<8x128xf32>
    tpu.vector_store %arg3[%c0_126, %c0_127], %486 {strides = array<i32>} : memref<8x128xf32, #tpu.memory_space<vmem>>, vector<8x128xf32>,
    return
  }
  func.func @transform_0(%arg0: i32) -> (i32, i32, i32) {
    %c0_i32 = arith.constant 0 : i32
    %c0_i32_0 = arith.constant 0 : i32
    %c0_i32_1 = arith.constant 0 : i32
    return %arg0, %c0_i32, %c0_i32_0 : i32, i32, i32
  }
  func.func @transform_1(%arg0: i32) -> (i32, i32, i32) {
    %c0_i32 = arith.constant 0 : i32
    %c0_i32_0 = arith.constant 0 : i32
    %c0_i32_1 = arith.constant 0 : i32
    return %arg0, %c0_i32, %c0_i32_0 : i32, i32, i32
  }
  func.func @transform_2(%arg0: i32) -> (i32, i32) {
    %c0_i32 = arith.constant 0 : i32
    %c0_i32_0 = arith.constant 0 : i32
    return %arg0, %c0_i32 : i32, i32
  }
}

</mosaic_0001>

<bundles_post_ra>
// kernel: tpu_custom_call.1
= control target key start
LH: loop header
LB: loop body
LE: loop exit
PB: predicated region body
PF: predicated region fallthrough
CT: control target
= control target key end

     0   :  { %7 = vsyncpa [#allocation3], 0  ;;  %s1626_s0 = inlined_call_operand.hbm [shape: f32[2,16,16], index: 0, kind: input, shape index: {}]   ;;  %s1627_s1 = inlined_call_operand.hbm [shape: f32[2,16,16], index: 1, kind: input, shape index: {}]   ;;  %s1628_s2 = inlined_call_operand.hbm [shape: f32[16,128], index: 2, kind: output, shape index: {}]  }
   0x1   :  { %9 = vsyncpa [#allocation3 + $0x1], 0 }
   0x2   :  { %10 = vsyncpa [#allocation6], 0 }
   0x3   :  { %12 = vsyncpa [#allocation6 + $0x1], 0 }
   0x4   :  { %13 = vsyncpa [#allocation4], 0 }
   0x5   :  { %15 = vsyncpa [#allocation4 + $0x1], 0  ;;  %s1195_s9 = smov 0   ;;  %s1197_s10 = smov 0  }
   0x6   :  { %s1199_s11 = smov 0   ;;  %s1201_s12 = smov 0  }
   0x7 LB: > { %s1216_s13 = sadd.s32 4294967295, %s1163_s12   ;;  %s945_s14 = sadd.s32 4294967294, %s1163_s12   ;;  %s1163_s12 = sphi %s1201_s12, %s1644_s12   ;;  %s1159_s11 = sphi %s1199_s11, %s1643_s11   ;;  %s1155_s10 = sphi %s1197_s10, %s1642_s10   ;;  %s1151_s9 = sphi %s1195_s9, %s1641_s9  }
   0x8   : > { %s1220_s15 = sadd.s32 1, %s1163_s12   ;;  %s28_s16 = sadd.s32 1, %s1159_s11 }
   0x9   : > { %s25_s17 = ssub.s32 %s1163_s12, %s1220_s15  ;;  %p35_p0 = scmp.ne.s32.totalorder %s1159_s11, %s1155_s10 }
   0xa   : > { %p26_p1 = scmp.eq.s32.totalorder %s25_s17, 0  ;;  %p36_p2 = scmp.eq.s32.totalorder %s1163_s12, 0 }
   0xb   : > { %p41_p3 = scmp.ne.s32.totalorder %s1155_s10, %s1151_s9  ;;  %p42_p4 = scmp.eq.s32.totalorder %s1216_s13, 0 }
   0xc   : > { %s1232_s18 = scalar_select %p26_p1, %s1159_s11, %s28_s16  }
   0xd   : > { %p1234_p5 = por %p36_p2, %p35_p0  ;;  %p1238_p6 = por %p42_p4, %p41_p3 }
   0xe   : > { %p91_p7 = scmp.eq.s32.totalorder %s1216_s13, 1  ;;  %p97_p8 = scmp.eq.s32.totalorder %s945_s14, 1 }
   0xf   : > { %s1632_s20 = scalar_select %p1238_p6, 1, 0 }
  0x10   : > { %p985_p10 = scmp.lt.s32.totalorder %s1163_s12, 2  ;;  %p1245_p11 = por %p91_p7, %p35_p0 }
  0x11   : > { %p1249_p12 = por %p97_p8, %p41_p3  ;;  %s1254_s23 = sand.u32 1, %s1159_s11  }
  0x12   : > { %s1633_s21 = scalar_select %p1245_p11, 1, 0 }
  0x13   : > { %s1634_s22 = scalar_select %p1249_p12, 1, 0 }
  0x14   : > { %s962_s24 = sshll.u32 %s1163_s12, 8  ;;  %s948_s25 = sshll.u32 %s1254_s23, 4 }
  0x15   : > { %s1263_s28 = scalar_lea.hbm %s1626_s0, %s962_s24  ;;  %s121_s29 = scalar_lea.vmem [#allocation2], %s948_s25 }
  0x16   : > { %s128_s30 = sshll.u32 %s121_s29, 4  ;;  %p1269_p13 = pnand %p985_p10, %p1234_p5  ;;  %s1273_s30 = int_to_ptr.vmem [resolvable:$true] %s128_s30 }
  0x17   : > { %s118_s4 = scalar_lea.sflag [#allocation3], %s1254_s23  ;;  %s1033_s5 = scalar_lea.hbm %s1263_s28, 256 }
  0x18   : > { %p1034_p0 = scmp.ne.s32.totalorder %s1263_s28, %s1033_s5  ;;  %p1035_p1 = pneg %p1269_p13 }
  0x19   : > { %s1038_s8 = scalar_lea.hbm %s1626_s0, 512  ;;  %p1039_p4 = scmp.lt.u32.totalorder %s1263_s28, %s1626_s0 }
  0x1a   : > { %p1036_p2 = pnand %p1035_p1, %p1034_p0  ;;  %p1040_p5 = scmp.lt.u32.totalorder %s1038_s8, %s1033_s5 }
  0x1b   : > { %p1042_p8 = scmp.lt.u32.totalorder %s1033_s5, %s1263_s28 }
  0x1c   : > { %p1037_p3 = pneg %p1036_p2  ;;  %p1041_p7 = por %p1040_p5, %p1039_p4 }
  0x1e   : > { %p1043_p10 = por %p1042_p8, %p1041_p7 }
  0x20   : > { %p1044_p9 = pnand %p1043_p10, %p1037_p3 }
  0x22   : > { %1047 = shalt.err (!%p1044_p9)
}
  0x23   : > { %s1048_s17 = scalar_lea.vmem %s1273_s30, 256  ;;  %s1165_s19 = smov [#allocation2]  }
  0x24   : > { %p1049_p0 = scmp.ne.s32.totalorder %s1273_s30, %s1048_s17  ;;  %s1053_s26 = sshll.u32 %s1165_s19, 4  ;;  %s1054_s26 = int_to_ptr.vmem [resolvable:$false] %s1053_s26 }
  0x25   : > { %s1055_s27 = scalar_lea.vmem %s1054_s26, 512  ;;  %p1056_p11 = scmp.lt.s32.totalorder %s1273_s30, %s1054_s26 }
  0x26   : > { %p1051_p2 = pnand %p1049_p0, %p1035_p1  ;;  %p1057_p4 = scmp.lt.s32.totalorder %s1055_s27, %s1048_s17 }
  0x28   : > { %p1052_p12 = pneg %p1051_p2  ;;  %p1058_p5 = por %p1057_p4, %p1056_p11 }
  0x2a   : > { %p1059_p7 = pnand %p1058_p5, %p1052_p12 }
  0x2c   : > { %1062 = shalt.err (!%p1059_p7)
}
  0x2d   : > { %s1166_s29 = smov 128   ;;  %s1167_s5 = smov 8  }
  0x2e   : > { %977 = dma.hbm_to_vmem [thread:$0]  (!%p1269_p13), %s1263_s28, 256, %s1273_s30, %s118_s4, %s1166_s29, %s1166_s29, %s1167_s5  }
  0x2f   : > { %p954_p9 = scmp.ge.s32.totalorder %s1163_s12, 1  ;;  %p157_p11 = scmp.lt.s32.totalorder %s1163_s12, 3 }
  0x30   : > { %s1317_s14 = scalar_lea.hbm %s1627_s1, %s962_s24  ;;  %s142_s16 = scalar_lea.vmem [#allocation5], %s948_s25 }
  0x31   : > { %p1308_p12 = pnand %p954_p9, %p157_p11  ;;  %s149_s17 = sshll.u32 %s142_s16, 4  ;;  %s1321_s17 = int_to_ptr.vmem [resolvable:$true] %s149_s17 }
  0x32   : > { %s139_s28 = scalar_lea.sflag [#allocation6], %s1254_s23  ;;  %s1063_s30 = scalar_lea.hbm %s1317_s14, 256 }
  0x33   : > { %p1064_p3 = scmp.ne.s32.totalorder %s1317_s14, %s1063_s30  ;;  %s1068_s24 = scalar_lea.hbm %s1627_s1, 512 }
  0x34   : > { %p1069_p0 = scmp.lt.u32.totalorder %s1317_s14, %s1627_s1  ;;  %p1070_p2 = scmp.lt.u32.totalorder %s1068_s24, %s1063_s30 }
  0x35   : > { %p1066_p8 = pnand %p1064_p3, %p1035_p1  ;;  %p1072_p5 = scmp.lt.u32.totalorder %s1063_s30, %s1317_s14 }
  0x36   : > { %p1071_p4 = por %p1070_p2, %p1069_p0 }
  0x37   : > { %p1067_p10 = pneg %p1066_p8 }
  0x38   : > { %p1073_p7 = por %p1072_p5, %p1071_p4 }
  0x3a   : > { %p1074_p9 = pnand %p1073_p7, %p1067_p10 }
  0x3c   : > { %1077 = shalt.err (!%p1074_p9)
}
  0x3d   : > { %s1078_s25 = scalar_lea.vmem %s1321_s17, 256  ;;  %s1168_s7 = smov [#allocation5]  }
  0x3e   : > { %p1079_p11 = scmp.ne.s32.totalorder %s1321_s17, %s1078_s25  ;;  %s1083_s8 = sshll.u32 %s1168_s7, 4  ;;  %s1084_s8 = int_to_ptr.vmem [resolvable:$false] %s1083_s8 }
  0x3f   : > { %s1085_s16 = scalar_lea.vmem %s1084_s8, 512  ;;  %p1086_p6 = scmp.lt.s32.totalorder %s1321_s17, %s1084_s8 }
  0x40   : > { %p1081_p3 = pnand %p1079_p11, %p1035_p1  ;;  %p1087_p0 = scmp.lt.s32.totalorder %s1085_s16, %s1078_s25 }
  0x42   : > { %p1082_p8 = pneg %p1081_p3  ;;  %p1088_p2 = por %p1087_p0, %p1086_p6 }
  0x44   : > { %p1089_p4 = pnand %p1088_p2, %p1082_p8 }
  0x46   : > { %1092 = shalt.err (!%p1089_p4)
}
  0x47   : > { %980 = dma.hbm_to_vmem [thread:$0]  (!%p1269_p13), %s1317_s14, 256, %s1321_s17, %s139_s28, %s1166_s29, %s1166_s29, %s1167_s5  }
  0x48   : > { %161 = sbr.rel (%p1308_p12) target bundleno = 566 (0x236), region = 28  ;;  %s1355_s30 = sand.u32 (!%p1308_p12), 1, %s1155_s10  }
  0x49   : > { %s955_s4 = sshll.u32 (!%p1308_p12), %s1355_s30, 4  ;;  %s164_s19 = scalar_lea.sflag (!%p1308_p12), [#allocation3], %s1355_s30 }
  0x4a   : > { %s167_s3 = scalar_lea.vmem (!%p1308_p12), [#allocation2], %s955_s4  ;;  %p1637_p6 = scmp.ne.s32.totalorder (!%p1308_p12), %s1632_s20, 0 }
  0x4f   : > { %1138 = dma.done.wait (%p1637_p6), %s164_s19, 256  }
  0x50   : > { %1140 = vsyncadd (%p1637_p6), %s164_s19, 4294967040  ;;  %s173_s23 = scalar_lea.sflag [#allocation6], %s1355_s30  ;;  %s1364_s29 = scalar_lea.vmem [#allocation5], %s955_s4 }
  0x51   : > { %1142 = dma.done.wait (%p1637_p6), %s173_s23, 256  }
  0x52   : > { %1144 = vsyncadd (%p1637_p6), %s173_s23, 4294967040  ;;  %v1370_v0 = vld [vmem:[%s167_s3] sm:$0xff]  ;;  %v1372_v1 = vld [vmem:[%s167_s3 + $0x8] sm:$0xff]  ;;  %vm238_vm0 = vcmask 1044480   ;;  %vm248_vm1 = vcmask 1043456   ;;  %vm258_vm2 = vcmask 1042432  }
  0x53   : > { %vm264_vm3 = vcmask 1041408   ;;  %v223_v2 = vmul.f32 0.0010283804, %v1370_v0  ;;  %v224_v3 = vmul.f32 0.0075987587, %v1370_v0  ;;  %v1385_v24 = vld [vmem:[%s1364_s29] sm:$0xff] }
  0x54   : > { %v229_v4 = vmul.f32 0.036000773, %v1370_v0  ;;  %v234_v5 = vmul.f32 0.1093607, %v1370_v0  ;;  %v235_v6 = vmul.f32 0.1093607, %v1372_v1  ;;  %v1389_v27 = vmul.f32 %v1385_v24, %v1385_v24 }
  0x55   : > { %v244_v7 = vmul.f32 0.21300554, %v1370_v0  ;;  %v226_v8 = vrot.slane %v224_v3, 1  ;;  %v245_v10 = vmul.f32 0.21300554, %v1372_v1  ;;  %vm270_vm4 = vcmask 1040384  }
  0x56   : > { %v231_v9 = vrot.slane %v229_v4, 2  ;;  %v254_v11 = vmul.f32 0.26601174, %v1370_v0  ;;  %v239_v12 = vrot.slane %v234_v5, 3  ;;  %v240_v13 = vrot.slane %v235_v6, 3  ;;  %v1396_v32 = vld [vmem:[%s1364_s29 + $0x8] sm:$0xff] }
  0x57   : > { %v249_v14 = vrot.slane %v244_v7, 4  ;;  %v255_v15 = vmul.f32 0.26601174, %v1372_v1  ;;  %v228_v16 = vadd.f32 %v226_v8, %v223_v2  ;;  %v250_v17 = vrot.slane %v245_v10, 4  ;;  %s1169_s20 = smov 126   ;;  %s1170_s5 = smov 127  }
  0x58   : > { %v259_v18 = vrot.slane %v254_v11, 5  ;;  %v265_v19 = vrot.slane %v244_v7, 6  ;;  %v241_v20 = vsel %vm238_vm0, %v239_v12, %v240_v13  ;;  %v266_v22 = vrot.slane %v245_v10, 6  ;;  %s1171_s6 = smov 125   ;;  %s1172_s14 = smov 124  }
  0x59   : > { %v260_v21 = vrot.slane %v255_v15, 5  ;;  %v271_v23 = vrot.slane %v234_v5, 7  ;;  %v233_v25 = vadd.f32 %v231_v9, %v228_v16  ;;  %v272_v26 = vrot.slane %v235_v6, 7  ;;  %s1173_s17 = smov 123   ;;  %s1174_s28 = smov 122  }
  0x5a   : > { %v251_v28 = vsel %vm248_vm1, %v249_v14, %v250_v17  ;;  %v267_v30 = vsel %vm264_vm3, %v265_v19, %v266_v22  ;;  %v276_v31 = vmul.f32 0.036000773, %v1372_v1  ;;  %v278_v34 = vmul.f32 0.0075987587, %v1372_v1  ;;  %s1175_s24 = smov 121   ;;  %s1176_s26 = smov 120  }
  0x5b   : > { %v261_v29 = vsel %vm258_vm2, %v259_v18, %v260_v21  ;;  %v243_v33 = vadd.f32 %v241_v20, %v233_v25  ;;  %v340_v35 = vmul.f32 0.0010283804, %v1385_v24  ;;  %v341_v36 = vmul.f32 0.0075987587, %v1385_v24  ;;  %s1177_s27 = smov 119   ;;  %s1178_s25 = smov 118  }
  0x5c   : > { %v273_v37 = vsel %vm270_vm4, %v271_v23, %v272_v26  ;;  %v283_v38 = vmul.f32 0.0010283804, %v1372_v1  ;;  %v346_v39 = vmul.f32 0.036000773, %v1385_v24  ;;  %v351_v40 = vmul.f32 0.1093607, %v1385_v24 }
  0x5d   : > { %v253_v41 = vadd.f32 %v251_v28, %v243_v33  ;;  %v343_v42 = vrot.slane %v341_v36, 1  ;;  %v352_v43 = vmul.f32 0.1093607, %v1396_v32  ;;  %v360_v44 = vmul.f32 0.21300554, %v1385_v24  ;;  %s957_s7 = sshll.u32 %s1355_s30, 3 }
  0x5e   : > { %v348_v45 = vrot.slane %v346_v39, 2  ;;  %v355_v46 = vrot.slane %v351_v40, 3  ;;  %v361_v47 = vmul.f32 0.21300554, %v1396_v32  ;;  %v369_v48 = vmul.f32 0.26601174, %v1385_v24 }
  0x5f   : > { %v263_v49 = vadd.f32 %v261_v29, %v253_v41  ;;  %v345_v50 = vadd.f32 %v343_v42, %v340_v35  ;;  %v356_v51 = vrot.slane %v352_v43, 3  ;;  %v364_v52 = vrot.slane %v360_v44, 4  ;;  %s959_s16 = sshll.u32 %s1216_s13, 7  ;;  %s201_s19 = scalar_lea.vmem [#allocation7], %s957_s7 }
  0x60   : > { %v365_v53 = vrot.slane %v361_v47, 4  ;;  %v370_v54 = vmul.f32 0.26601174, %v1396_v32  ;;  %v373_v55 = vrot.slane %v369_v48, 5  ;;  %v378_v56 = vrot.slane %v360_v44, 6  ;;  %s852_s3 = sshll.u32 %s201_s19, 4  ;;  %s1584_s3 = int_to_ptr.vmem [resolvable:$true] %s852_s3 }
  0x61   : > { %v269_v57 = vadd.f32 %v267_v30, %v263_v49  ;;  %v350_v58 = vadd.f32 %v348_v45, %v345_v50  ;;  %v357_v59 = vsel %vm238_vm0, %v355_v46, %v356_v51  ;;  %v379_v60 = vrot.slane %v361_v47, 6  ;;  %s1093_s13 = scalar_lea.vmem %s1584_s3, 128  ;;  %p1638_p1 = scmp.ne.s32.totalorder %s1633_s21, 0 }
  0x62   : > { %v366_v61 = vsel %vm248_vm1, %v364_v52, %v365_v53  ;;  %v374_v62 = vrot.slane %v370_v54, 5  ;;  %v383_v63 = vrot.slane %v351_v40, 7  ;;  %v384_v2 = vrot.slane %v352_v43, 7  ;;  %p1094_p13 = scmp.ne.s32.totalorder %s1584_s3, %s1093_s13 }
  0x63   : > { %v275_v3 = vadd.f32 %v273_v37, %v269_v57  ;;  %v280_v4 = vrot.slane %v278_v34, 1  ;;  %v285_v5 = vrot.slane %v283_v38, 2  ;;  %v359_v6 = vadd.f32 %v357_v59, %v350_v58 }
  0x64   : > { %v375_v7 = vsel %vm258_vm2, %v373_v55, %v374_v62  ;;  %v380_v8 = vsel %vm264_vm3, %v378_v56, %v379_v60  ;;  %v388_v9 = vmul.f32 0.036000773, %v1396_v32  ;;  %v390_v10 = vmul.f32 0.0075987587, %v1396_v32  ;;  %p1095_p12 = pnand %p1094_p13, %p1638_p1 }
  0x65   : > { %v277_v11 = vadd.f32 %v276_v31, %v275_v3  ;;  %v368_v12 = vadd.f32 %v366_v61, %v359_v6  ;;  %v395_v13 = vmul.f32 0.0010283804, %v1396_v32  ;;  %v567_v14 = vmul.f32 %v1396_v32, %v1396_v32 }
  0x66   : > { %v385_v15 = vsel %vm270_vm4, %v383_v63, %v384_v2  ;;  %v568_v16 = vmul.f32 0.0010283804, %v1389_v27  ;;  %v569_v17 = vmul.f32 0.0075987587, %v1389_v27  ;;  %v574_v18 = vmul.f32 0.036000773, %v1389_v27  ;;  %p1096_p10 = pneg %p1095_p12 }
  0x67   : > { %v282_v19 = vadd.f32 %v280_v4, %v277_v11  ;;  %v377_v20 = vadd.f32 %v375_v7, %v368_v12  ;;  %v579_v21 = vmul.f32 0.1093607, %v1389_v27  ;;  %v580_v22 = vmul.f32 0.1093607, %v567_v14 }
  0x68   : > { %v571_v23 = vrot.slane %v569_v17, 1  ;;  %v576_v25 = vrot.slane %v574_v18, 2  ;;  %v588_v26 = vmul.f32 0.21300554, %v1389_v27  ;;  %v589_v28 = vmul.f32 0.21300554, %v567_v14 }
  0x69   : > { %v1425_v29 = vadd.f32 %v285_v5, %v282_v19  ;;  %v382_v30 = vadd.f32 %v380_v8, %v377_v20  ;;  %v583_v31 = vrot.slane %v579_v21, 3  ;;  %v584_v33 = vrot.slane %v580_v22, 3 }
  0x6a   : > { %v573_v34 = vadd.f32 %v571_v23, %v568_v16  ;;  %v592_v35 = vrot.slane %v588_v26, 4  ;;  %v593_v36 = vrot.slane %v589_v28, 4  ;;  %v597_v37 = vmul.f32 0.26601174, %v1389_v27 }
  0x6b   : > { %v1429_v38 = vmul.f32 0.036000773, %v1425_v29  ;;  %v1432_v39 = vmul.f32 0.0075987587, %v1425_v29  ;;  %v387_v40 = vadd.f32 %v385_v15, %v382_v30  ;;  %v392_v41 = vrot.slane %v390_v10, 1 }
  0x6c   : > { %v397_v42 = vrot.slane %v395_v13, 2  ;;  %v578_v43 = vadd.f32 %v576_v25, %v573_v34  ;;  %v585_v44 = vsel %vm238_vm0, %v583_v31, %v584_v33  ;;  %v594_v45 = vsel %vm248_vm1, %v592_v35, %v593_v36 }
  0x6d   : > { %297 = vrot.lane.b32.xlu1 %v1429_v38, %s1169_s20  ;;  %291 = vrot.lane.b32.xlu0 %v1432_v39, %s1170_s5  ;;  %v389_v27 = vadd.f32 %v388_v9, %v387_v40  ;;  %v598_v46 = vmul.f32 0.26601174, %v567_v14  ;;  %v601_v47 = vrot.slane %v597_v37, 5  ;;  %v606_v49 = vrot.slane %v588_v26, 6 }
  0x6e   : > { %v587_v48 = vadd.f32 %v585_v44, %v578_v43  ;;  %v607_v50 = vrot.slane %v589_v28, 6  ;;  %v611_v53 = vrot.slane %v579_v21, 7  ;;  %v612_v54 = vrot.slane %v580_v22, 7 }
  0x6f   : > { %v394_v51 = vadd.f32 %v392_v41, %v389_v27  ;;  %v602_v52 = vrot.slane %v598_v46, 5  ;;  %v1441_v55 = vmul.f32 0.1093607, %v1425_v29  ;;  %v618_v57 = vmul.f32 0.0075987587, %v567_v14 }
  0x70   : > { %v596_v56 = vadd.f32 %v594_v45, %v587_v48  ;;  %v452_v58 = vmul.f32 %v1370_v0, %v1370_v0  ;;  %v608_v61 = vsel %vm264_vm3, %v606_v49, %v607_v50  ;;  %v453_v62 = vmul.f32 %v1372_v1, %v1372_v1 }
  0x71   : > { %v1445_v59 = vadd.f32 %v397_v42, %v394_v51  ;;  %v603_v60 = vsel %vm258_vm2, %v601_v47, %v602_v52  ;;  %v1452_v63 = vmul.f32 0.21300554, %v1425_v29  ;;  %v616_v3 = vmul.f32 0.036000773, %v567_v14 }
  0x72   : > { %v605_v2 = vadd.f32 %v603_v60, %v596_v56  ;;  %v623_v4 = vmul.f32 0.0010283804, %v567_v14  ;;  %v613_v7 = vsel %vm270_vm4, %v611_v53, %v612_v54  ;;  %v620_v8 = vrot.slane %v618_v57, 1 }
  0x73   : > { %v1455_v5 = vmul.f32 0.036000773, %v1445_v59  ;;  %v1458_v6 = vmul.f32 0.0075987587, %v1445_v59  ;;  %v1462_v9 = vmul.f32 0.1093607, %v1445_v59  ;;  %v680_v48 = vmul.f32 %v1385_v24, %v1370_v0 }
  0x74   : > { %v610_v10 = vadd.f32 %v608_v61, %v605_v2  ;;  %v454_v11 = vmul.f32 0.0010283804, %v452_v58  ;;  %v455_v12 = vmul.f32 0.0075987587, %v452_v58  ;;  %v460_v13 = vmul.f32 0.036000773, %v452_v58 }
  0x75   : > { %409 = vrot.lane.b32.xlu1 %v1455_v5, %s1169_s20  ;;  %403 = vrot.lane.b32.xlu0 %v1458_v6, %s1170_s5  ;;  %v465_v14 = vmul.f32 0.1093607, %v452_v58  ;;  %v466_v15 = vmul.f32 0.1093607, %v453_v62  ;;  %v474_v18 = vmul.f32 0.21300554, %v452_v58  ;;  %v1485_v52 = vmul.f32 %v1396_v32, %v1372_v1 }
  0x76   : > { %v615_v16 = vadd.f32 %v613_v7, %v610_v10  ;;  %v457_v17 = vrot.slane %v455_v12, 1  ;;  %v475_v19 = vmul.f32 0.21300554, %v453_v62  ;;  %v462_v20 = vrot.slane %v460_v13, 2 }
  0x77   : > { %v469_v21 = vrot.slane %v465_v14, 3  ;;  %v470_v22 = vrot.slane %v466_v15, 3  ;;  %v483_v23 = vmul.f32 0.26601174, %v452_v58  ;;  %v478_v28 = vrot.slane %v474_v18, 4 }
  0x78   : > { %v617_v25 = vadd.f32 %v616_v3, %v615_v16  ;;  %v459_v26 = vadd.f32 %v457_v17, %v454_v11  ;;  %v479_v30 = vrot.slane %v475_v19, 4  ;;  %v419_v31 = vmul.f32 0.21300554, %v1445_v59 }
  0x79   : > { %415 = vrot.lane.b32.xlu1 %v1462_v9, %s1171_s6  ;;  %303 = vrot.lane.b32.xlu0 %v1441_v55, %s1171_s6  ;;  %v471_v33 = vsel %vm238_vm0, %v469_v21, %v470_v22  ;;  %v484_v34 = vmul.f32 0.26601174, %v453_v62  ;;  %v487_v35 = vrot.slane %v483_v23, 5  ;;  %v313_v36 = vmul.f32 0.26601174, %v1425_v29 }
  0x7a   : > { %v625_v37 = vrot.slane %v623_v4, 2  ;;  %v464_v40 = vadd.f32 %v462_v20, %v459_v26  ;;  %v492_v41 = vrot.slane %v474_v18, 6  ;;  %v622_v42 = vadd.f32 %v620_v8, %v617_v25 }
  0x7b   : > { %v480_v43 = vsel %vm248_vm1, %v478_v28, %v479_v30  ;;  %v488_v44 = vrot.slane %v484_v34, 5  ;;  %v493_v27 = vrot.slane %v475_v19, 6  ;;  %v425_v45 = vmul.f32 0.26601174, %v1445_v59 }
  0x7c   : > { %v473_v46 = vadd.f32 %v471_v33, %v464_v40  ;;  %v504_v47 = vmul.f32 0.0075987587, %v453_v62  ;;  %v497_v50 = vrot.slane %v465_v14, 7  ;;  %v498_v51 = vrot.slane %v466_v15, 7 }
  0x7d   : > { %421 = vrot.lane.b32.xlu1 %v419_v31, %s1172_s14  ;;  %309 = vrot.lane.b32.xlu0 %v1452_v63, %s1172_s14  ;;  %v489_v49 = vsel %vm258_vm2, %v487_v35, %v488_v44  ;;  %v502_v54 = vmul.f32 0.036000773, %v453_v62  ;;  %v1487_v56 = vadd.f32 %v625_v37, %v622_v42  ;;  %v494_v57 = vsel %vm264_vm3, %v492_v41, %v493_v27 }
  0x7e   : > { %v482_v53 = vadd.f32 %v480_v43, %v473_v46  ;;  %v509_v58 = vmul.f32 0.0010283804, %v453_v62  ;;  %v682_v60 = vmul.f32 0.0010283804, %v680_v48  ;;  %v506_v2 = vrot.slane %v504_v47, 1 }
  0x7f   : > { %v683_v3 = vmul.f32 0.0075987587, %v680_v48  ;;  %v688_v4 = vmul.f32 0.036000773, %v680_v48  ;;  %v499_v7 = vsel %vm270_vm4, %v497_v50, %v498_v51  ;;  %v693_v8 = vmul.f32 0.1093607, %v680_v48 }
  0x80   : > { %v491_v61 = vadd.f32 %v489_v49, %v482_v53  ;;  %v694_v10 = vmul.f32 0.1093607, %v1485_v52  ;;  %v702_v11 = vmul.f32 0.21300554, %v680_v48  ;;  %v703_v62 = vmul.f32 0.21300554, %v1485_v52 }
  0x81   : > { %427 = vrot.lane.b32.xlu1 %v425_v45, %s1173_s17  ;;  %315 = vrot.lane.b32.xlu0 %v313_v36, %s1173_s17  ;;  %v685_v13 = vrot.slane %v683_v3, 1  ;;  %v690_v14 = vrot.slane %v688_v4, 2  ;;  %v697_v15 = vrot.slane %v693_v8, 3  ;;  %v711_v18 = vmul.f32 0.26601174, %v680_v48 }
  0x82   : > { %v496_v12 = vadd.f32 %v494_v57, %v491_v61  ;;  %v698_v16 = vrot.slane %v694_v10, 3  ;;  %v706_v17 = vrot.slane %v702_v11, 4  ;;  %v707_v21 = vrot.slane %v703_v62, 4 }
  0x83   : > { %v687_v20 = vadd.f32 %v685_v13, %v682_v60  ;;  %v712_v22 = vmul.f32 0.26601174, %v1485_v52  ;;  %v1500_v23 = vmul.f32 0.0075987587, %v1487_v56  ;;  %v511_v28 = vrot.slane %v509_v58, 2 }
  0x84   : > { %v501_v19 = vadd.f32 %v499_v7, %v496_v12  ;;  %v699_v25 = vsel %vm238_vm0, %v697_v15, %v698_v16  ;;  %v708_v33 = vsel %vm248_vm1, %v706_v17, %v707_v21  ;;  %v715_v34 = vrot.slane %v711_v18, 5 }
  0x85   : > { %431 = vrot.lane.b32.xlu1 %v419_v31, %s1174_s28  ;;  %319 = vrot.lane.b32.xlu0 %v1452_v63, %s1174_s28  ;;  %v692_v30 = vadd.f32 %v690_v14, %v687_v20  ;;  %v716_v35 = vrot.slane %v712_v22, 5  ;;  %v635_v31 = vmul.f32 0.036000773, %v1487_v56  ;;  %v720_v42 = vrot.slane %v702_v11, 6 }
  0x86   : > { %v503_v26 = vadd.f32 %v502_v54, %v501_v19  ;;  %v721_v43 = vrot.slane %v703_v62, 6  ;;  %v641_v27 = vmul.f32 0.1093607, %v1487_v56  ;;  %v725_v48 = vrot.slane %v693_v8, 7 }
  0x87   : > { %v701_v37 = vadd.f32 %v699_v25, %v692_v30  ;;  %v717_v41 = vsel %vm258_vm2, %v715_v34, %v716_v35  ;;  %v726_v49 = vrot.slane %v694_v10, 7  ;;  %v647_v50 = vmul.f32 0.21300554, %v1487_v56 }
  0x88   : > { %v508_v36 = vadd.f32 %v506_v2, %v503_v26  ;;  %v722_v47 = vsel %vm264_vm3, %v720_v42, %v721_v43  ;;  %v653_v57 = vmul.f32 0.26601174, %v1487_v56  ;;  %v730_v61 = vmul.f32 0.036000773, %v1485_v52 }
  0x89   : > { %631 = vrot.lane.b32.xlu1 %v1500_v23, %s1170_s5  ;;  %v710_v40 = vadd.f32 %v708_v33, %v701_v37  ;;  %v727_v54 = vsel %vm270_vm4, %v725_v48, %v726_v49  ;;  %v732_v2 = vmul.f32 0.0075987587, %v1485_v52  ;;  %v737_v8 = vmul.f32 0.0010283804, %v1485_v52 }
  0x8a   : > { %v1507_v63 = vadd.f32 %v511_v28, %v508_v36  ;;  %v206_v16 = vsub.f32 %v1370_v0, %v1385_v24  ;;  %v207_v17 = vsub.f32 %v1372_v1, %v1396_v32  ;;  %vm210_vm5 = vcmask 130048  }
  0x8b   : > { %v719_v46 = vadd.f32 %v717_v41, %v710_v40  ;;  %v734_v7 = vrot.slane %v732_v2, 1  ;;  %v739_v11 = vrot.slane %v737_v8, 2  ;;  %vm812_vm6 = vcmask 46080  }
  0x8c   : > { %v515_v44 = vmul.f32 0.0075987587, %v1507_v63  ;;  %v521_v45 = vmul.f32 0.036000773, %v1507_v63  ;;  %v527_v51 = vmul.f32 0.1093607, %v1507_v63  ;;  %v208_v20 = vmul.f32 %v206_v16, %v206_v16 }
  0x8d   : > { %637 = vrot.lane.b32.xlu1 %v635_v31, %s1169_s20  ;;  %v724_v53 = vadd.f32 %v722_v47, %v719_v46  ;;  %v533_v58 = vmul.f32 0.21300554, %v1507_v63  ;;  %v539_v3 = vmul.f32 0.26601174, %v1507_v63  ;;  %v209_v21 = vmul.f32 %v207_v17, %v207_v17 }
  0x8e   : > { %517 = vrot.lane.b32.xlu0 %v515_v44, %s1170_s5  ;;  %v211_v25 = vsel %vm210_vm5, %v208_v20, 0.0 }
  0x8f   : > { %v729_v60 = vadd.f32 %v727_v54, %v724_v53  ;;  %v212_v26 = vsel %vm210_vm5, %v209_v21, 0.0 }
  0x90   : > { %v213_v33 = vadd.f32 %v212_v26, %v211_v25 }
  0x91   : > { %643 = vrot.lane.b32.xlu1 %v641_v27, %s1171_s6  ;;  %v731_v4 = vadd.f32 %v730_v61, %v729_v60 }
  0x92   : > { %523 = vrot.lane.b32.xlu0 %v521_v45, %s1169_s20 }
  0x93   : > { %v736_v10 = vadd.f32 %v734_v7, %v731_v4 }
  0x95   : > { %649 = vrot.lane.b32.xlu1 %v647_v50, %s1172_s14  ;;  %v741_v12 = vadd.f32 %v739_v11, %v736_v10 }
  0x96   : > { %529 = vrot.lane.b32.xlu0 %v527_v51, %s1171_s6 }
  0x97   : > { %v743_v52 = vmul.f32 0.0075987587, %v741_v12  ;;  %v761_v13 = vmul.f32 0.21300554, %v741_v12 }
  0x99   : > { %655 = vrot.lane.b32.xlu1 %v653_v57, %s1173_s17 }
  0x9a   : > { %535 = vrot.lane.b32.xlu0 %v533_v58, %s1172_s14 }
  0x9d   : > { %435 = vrot.lane.b32.xlu1 %v1462_v9, %s1175_s24  ;;  %v749_v9 = vmul.f32 0.036000773, %v741_v12 }
  0x9e   : > { %541 = vrot.lane.b32.xlu0 %v539_v3, %s1173_s17 }
  0xa1   : > { %659 = vrot.lane.b32.xlu1 %v647_v50, %s1174_s28 }
  0xa2   : > { %323 = vrot.lane.b32.xlu0 %v1441_v55, %s1175_s24  ;;  %v755_v55 = vmul.f32 0.1093607, %v741_v12 }
  0xa5   : > { %327 = vrot.lane.b32.xlu1 %v1429_v38, %s1176_s26  ;;  %v288_v38 = vmul.f32 0.0010283804, %v1425_v29  ;;  %v1560_v29 = vmul.f32 0.0010283804, %v1507_v63 }
  0xa6   : > { %545 = vrot.lane.b32.xlu0 %v533_v58, %s1174_s28 }
  0xa9   : > { %549 = vrot.lane.b32.xlu1 %v527_v51, %s1175_s24 }
  0xaa   : > { %745 = vrot.lane.b32.xlu0 %v743_v52, %s1170_s5  ;;  %s839_s5 = scalar_lea.sflag [#allocation4], %s1355_s30 }
  0xad   : > { %751 = vrot.lane.b32.xlu1 %v749_v9, %s1169_s20  ;;  %s1582_s20 = scalar_lea.hbm %s1628_s2, %s959_s16 }
  0xae   : > { %439 = vrot.lane.b32.xlu0 %v1455_v5, %s1176_s26  ;;  %v400_v5 = vmul.f32 0.0010283804, %v1445_v59  ;;  %v1565_v59 = vmul.f32 0.0010283804, %v741_v12 }
  0xb1   : > { %443 = vrot.lane.b32.xlu1 %v1458_v6, %s1177_s27  ;;  %v1555_v6 = vmul.f32 0.0010283804, %v1487_v56 }
  0xb2   : > { %663 = vrot.lane.b32.xlu0 %v641_v27, %s1175_s24 }
  0xb5   : > { %667 = vrot.lane.b32.xlu1 %v635_v31, %s1176_s26 }
  0xb6   : > { %331 = vrot.lane.b32.xlu0 %v1432_v39, %s1177_s27  ;;  %v767_v39 = vmul.f32 0.26601174, %v741_v12 }
  0xb9   : > { %336 = vrot.lane.b32.xlu1 %v288_v38, %s1178_s25 }
  0xba   : > { %553 = vrot.lane.b32.xlu0 %v521_v45, %s1176_s26 }
  0xbd   : > { %557 = vrot.lane.b32.xlu1 %v515_v44, %s1177_s27 }
  0xbe   : > { %757 = vrot.lane.b32.xlu0 %v755_v55, %s1171_s6  ;;  %s1179_s6 = smov [#allocation7]  }
  0xc1   : > { %763 = vrot.lane.b32.xlu1 %v761_v13, %s1172_s14  ;;  %s1097_s14 = sshll.u32 %s1179_s6, 4  ;;  %s1098_s14 = int_to_ptr.vmem [resolvable:$false] %s1097_s14 }
  0xc2   : > { %448 = vrot.lane.b32.xlu0 %v400_v5, %s1178_s25  ;;  %p1100_p5 = scmp.lt.s32.totalorder %s1584_s3, %s1098_s14 }
  0xc5   : > { %676 = vrot.lane.b32.xlu1 %v1555_v6, %s1178_s25 }
  0xc6   : > { %671 = vrot.lane.b32.xlu0 %v1500_v23, %s1177_s27 }
  0xc9   : > { %773 = vrot.lane.b32.xlu1 %v761_v13, %s1174_s28 }
  0xca   : > { %562 = vrot.lane.b32.xlu0 %v1560_v29, %s1178_s25 }
  0xcd   : > { %781 = vrot.lane.b32.xlu1 %v749_v9, %s1176_s26 }
  0xce   : > { %769 = vrot.lane.b32.xlu0 %v767_v39, %s1173_s17  ;;  %s1099_s17 = scalar_lea.vmem %s1098_s14, 256 }
  0xcf   : > { %p1101_p7 = scmp.lt.s32.totalorder %s1099_s17, %s1093_s13 }
  0xd1   : > { %790 = vrot.lane.b32.xlu1 %v1565_v59, %s1178_s25  ;;  %p1102_p9 = por %p1101_p7, %p1100_p5 }
  0xd2   : > { %777 = vrot.lane.b32.xlu0 %v755_v55, %s1175_s24 }
  0xd3   : > { %p1103_p11 = pnand %p1102_p9, %p1096_p10 }
  0xd6   : > { %785 = vrot.lane.b32.xlu0 %v743_v52, %s1177_s27 }
  0xdf   : > { %v292_v56 = vpop.permute.xlu0 %291  ;;  %v298_v62 = vpop.permute.xlu1 %297 }
  0xe0   : > { %v294_v14 = vadd.f32 %v292_v56, %v288_v38 }
  0xe2   : > { %v300_v15 = vadd.f32 %v298_v62, %v294_v14 }
  0xe7   : > { %v410_v18 = vpop.permute.xlu1 %409  ;;  %v404_v19 = vpop.permute.xlu0 %403 }
  0xe8   : > { %v406_v50 = vadd.f32 %v404_v19, %v400_v5 }
  0xea   : > { %v412_v54 = vadd.f32 %v410_v18, %v406_v50 }
  0xeb   : > { %v416_v22 = vpop.permute.xlu1 %415  ;;  %v304_v23 = vpop.permute.xlu0 %303 }
  0xec   : > { %v306_v60 = vadd.f32 %v304_v23, %v300_v15  ;;  %v418_v61 = vadd.f32 %v416_v22, %v412_v54 }
  0xef   : > { %v422_v28 = vpop.permute.xlu1 %421  ;;  %v310_v30 = vpop.permute.xlu0 %309 }
  0xf0   : > { %v312_v2 = vadd.f32 %v310_v30, %v306_v60  ;;  %v424_v8 = vadd.f32 %v422_v28, %v418_v61 }
  0xf3   : > { %v428_v34 = vpop.permute.xlu1 %427  ;;  %v316_v35 = vpop.permute.xlu0 %315 }
  0xf4   : > { %v318_v10 = vadd.f32 %v316_v35, %v312_v2  ;;  %v430_v12 = vadd.f32 %v428_v34, %v424_v8 }
  0xf5   : > { %214 = vadd.xlane.f32.xlu0 %v213_v33 }
  0xf7   : > { %v432_v36 = vpop.permute.xlu1 %431  ;;  %v320_v0 = vpop.permute.xlu0 %319 }
  0xf8   : > { %v322_v52 = vadd.f32 %v320_v0, %v318_v10  ;;  %v434_v5 = vadd.f32 %v432_v36, %v430_v12 }
  0xfb   : > { %v632_v24 = vpop.permute.xlu1 %631 }
  0xfc   : > { %v634_v3 = vadd.f32 %v632_v24, %v1555_v6 }
  0xff   : > { %v638_v37 = vpop.permute.xlu1 %637 }
 0x100   : > { %v518_v1 = vpop.permute.xlu0 %517  ;;  %v640_v9 = vadd.f32 %v638_v37, %v634_v3 }
 0x101   : > { %v520_v11 = vadd.f32 %v518_v1, %v1560_v29 }
 0x103   : > { %v644_v32 = vpop.permute.xlu1 %643 }
 0x104   : > { %v524_v31 = vpop.permute.xlu0 %523  ;;  %v646_v39 = vadd.f32 %v644_v32, %v640_v9 }
 0x105   : > { %v526_v55 = vadd.f32 %v524_v31, %v520_v11 }
 0x107   : > { %v650_v63 = vpop.permute.xlu1 %649 }
 0x108   : > { %v530_v40 = vpop.permute.xlu0 %529  ;;  %v652_v62 = vadd.f32 %v650_v63, %v646_v39 }
 0x109   : > { %v532_v14 = vadd.f32 %v530_v40, %v526_v55 }
 0x10b   : > { %v656_v41 = vpop.permute.xlu1 %655 }
 0x10c   : > { %v536_v42 = vpop.permute.xlu0 %535  ;;  %v658_v19 = vadd.f32 %v656_v41, %v652_v62 }
 0x10d   : > { %v538_v17 = vadd.f32 %v536_v42, %v532_v14 }
 0x10f   : > { %v436_v43 = vpop.permute.xlu1 %435 }
 0x110   : > { %v542_v44 = vpop.permute.xlu0 %541  ;;  %v438_v15 = vadd.f32 %v436_v43, %v434_v5 }
 0x111   : > { %v544_v29 = vadd.f32 %v542_v44, %v538_v17 }
 0x113   : > { %v660_v27 = vpop.permute.xlu1 %659 }
 0x114   : > { %v324_v45 = vpop.permute.xlu0 %323  ;;  %v662_v22 = vadd.f32 %v660_v27, %v658_v19 }
 0x115   : > { %v326_v56 = vadd.f32 %v324_v45, %v322_v52 }
 0x117   : > { %v328_v46 = vpop.permute.xlu1 %327 }
 0x118   : > { %v546_v47 = vpop.permute.xlu0 %545  ;;  %v330_v16 = vadd.f32 %v328_v46, %v326_v56 }
 0x119   : > { %v548_v28 = vadd.f32 %v546_v47, %v544_v29 }
 0x11b   : > { %v550_v48 = vpop.permute.xlu1 %549 }
 0x11c   : > { %v746_v49 = vpop.permute.xlu0 %745  ;;  %v552_v35 = vadd.f32 %v550_v48, %v548_v28 }
 0x11d   : > { %v748_v31 = vadd.f32 %v746_v49, %v1565_v59 }
 0x11f   : > { %v752_v51 = vpop.permute.xlu1 %751 }
 0x120   : > { %v440_v53 = vpop.permute.xlu0 %439  ;;  %v754_v42 = vadd.f32 %v752_v51, %v748_v31 }
 0x121   : > { %v442_v20 = vadd.f32 %v440_v53, %v438_v15 }
 0x123   : > { %v444_v57 = vpop.permute.xlu1 %443 }
 0x124   : > { %v664_v58 = vpop.permute.xlu0 %663  ;;  %v446_v23 = vadd.f32 %v444_v57, %v442_v20 }
 0x125   : > { %v666_v33 = vadd.f32 %v664_v58, %v662_v22 }
 0x127   : > { %v668_v4 = vpop.permute.xlu1 %667 }
 0x128   : > { %v332_v7 = vpop.permute.xlu0 %331  ;;  %v670_v36 = vadd.f32 %v668_v4, %v666_v33 }
 0x129   : > { %v334_v21 = vadd.f32 %v332_v7, %v330_v16 }
 0x12b   : > { %v337_v38 = vpop.permute.xlu1 %336 }
 0x12c   : > { %v554_v13 = vpop.permute.xlu0 %553  ;;  %v339_v25 = vadd.f32 %v337_v38, %v334_v21 }
 0x12d   : > { %v556_v63 = vadd.f32 %v554_v13, %v552_v35 }
 0x12e   : > { %v795_v0 = vmul.f32 %v339_v25, %v339_v25 }
 0x12f   : > { %v558_v6 = vpop.permute.xlu1 %557 }
 0x130   : > { %v758_v18 = vpop.permute.xlu0 %757  ;;  %v560_v43 = vadd.f32 %v558_v6, %v556_v63 }
 0x131   : > { %v760_v46 = vadd.f32 %v758_v18, %v754_v42 }
 0x133   : > { %v764_v26 = vpop.permute.xlu1 %763 }
 0x134   : > { %v449_v30 = vpop.permute.xlu0 %448  ;;  %v766_v48 = vadd.f32 %v764_v26, %v760_v46  ;;  %v823_v26 = vlaneseq }
 0x135   : > { %v451_v34 = vadd.f32 %v449_v30, %v446_v23 }
 0x136   : > { %v824_v28 = vshrl.u32 %v823_v26, 7  ;;  %v826_v30 = vand.u32 127, %v823_v26 }
 0x137   : > { %v794_v24 = vmul.f32 %v451_v34, %v339_v25  ;;  %v796_v37 = vmul.f32 %v451_v34, %v451_v34  ;;  %v677_v32 = vpop.permute.xlu1 %676 }
 0x138   : > { %v672_v1 = vpop.permute.xlu0 %671  ;;  %vm827_vm7 = vcmp.eq.s32.totalorder %v824_v28, 0  ;;  %vm828_vm8 = vcmp.eq.s32.totalorder %v826_v30, 0  ;;  %vm832_vm9 = vcmp.eq.s32.totalorder %v826_v30, 1 }
 0x139   : > { %v803_v40 = vadd.f32 %v796_v37, %v795_v0  ;;  %v674_v41 = vadd.f32 %v672_v1, %v670_v36  ;;  %v797_v12 = vmul.f32 2.0, %v794_v24  ;;  %vm829_vm10 = vmand %vm827_vm7, %vm828_vm8 }
 0x13a   : > { %vm833_vm11 = vmand %vm827_vm7, %vm832_vm9 }
 0x13b   : > { %v679_v44 = vadd.f32 %v677_v32, %v674_v41  ;;  %v774_v45 = vpop.permute.xlu1 %773  ;;  %v804_v61 = vadd.f32 0.0001, %v803_v40  ;;  %v798_v38 = vadd.f32 0.0001, %v797_v12 }
 0x13c   : > { %v563_v27 = vpop.permute.xlu0 %562 }
 0x13d   : > { %v565_v47 = vadd.f32 %v563_v27, %v560_v43  ;;  %v806_v50 = vsub.f32 %v679_v44, %v796_v37 }
 0x13f   : > { %v805_v53 = vsub.f32 %v565_v47, %v795_v0  ;;  %v782_v60 = vpop.permute.xlu1 %781 }
 0x140   : > { %v770_v54 = vpop.permute.xlu0 %769 }
 0x141   : > { %v807_v57 = vadd.f32 %v806_v50, %v805_v53  ;;  %v772_v58 = vadd.f32 %v770_v54, %v766_v48 }
 0x143   : > { %v808_v2 = vadd.f32 0.0009, %v807_v57  ;;  %v776_v59 = vadd.f32 %v774_v45, %v772_v58  ;;  %v791_v8 = vpop.permute.xlu1 %790 }
 0x144   : > { %v778_v49 = vpop.permute.xlu0 %777 }
 0x145   : > { %v809_v3 = vmul.f32 %v808_v2, %v804_v61  ;;  %v780_v4 = vadd.f32 %v778_v49, %v776_v59 }
 0x147   : > { %v784_v51 = vadd.f32 %v782_v60, %v780_v4  ;;  %1031 = vrcp.f32 %v809_v3 }
 0x148   : > { %v786_v7 = vpop.permute.xlu0 %785 }
 0x149   : > { %v788_v10 = vadd.f32 %v786_v7, %v784_v51 }
 0x14b   : > { %v793_v11 = vadd.f32 %v791_v8, %v788_v10 }
 0x14d   : > { %v799_v52 = vsub.f32 %v793_v11, %v794_v24 }
 0x14f   : > { %v800_v9 = vmul.f32 2.0, %v799_v52 }
 0x151   : > { %v801_v55 = vadd.f32 0.0009, %v800_v9  ;;  %v1032_v5 = vpop.eup %1031 }
 0x153   : > { %v802_v13 = vmul.f32 %v801_v55, %v798_v38 }
 0x155   : > { %v811_v39 = vmul.f32 %v1032_v5, %v802_v13 }
 0x157   : > { %v813_v56 = vsel %vm812_vm6, %v811_v39, 0.0 }
 0x158   : > { %814 = vadd.xlane.f32.xlu1 %v813_v56 }
 0x182   : > { %v215_v14 = vpop.xlane.xlu0 %214 }
 0x183   : > { %v216_v62 = vrot.slane %v215_v14, 4 }
 0x185   : > { %v217_v15 = vadd.f32 %v216_v62, %v215_v14 }
 0x187   : > { %v218_v16 = vrot.slane %v217_v15, 2 }
 0x189   : > { %v219_v6 = vadd.f32 %v218_v16, %v217_v15 }
 0x18b   : > { %v220_v17 = vrot.slane %v219_v6, 1 }
 0x18d   : > { %v221_v18 = vadd.f32 %v220_v17, %v219_v6 }
 0x18f   : > { %964 = vpush %v221_v18 }
 0x1c0   : > { %s965_s8 = spop %964 }
 0x1c1   : > { %v830_v33 = vstv %s965_s8 }
 0x1c2   : > { %v831_v35 = vsel %vm829_vm10, %v830_v33, 0.0 }
 0x1e5   : > { %v815_v19 = vpop.xlane.xlu1 %814 }
 0x1e6   : > { %v816_v20 = vrot.slane %v815_v19, 4 }
 0x1e8   : > { %v817_v21 = vadd.f32 %v816_v20, %v815_v19 }
 0x1ea   : > { %v818_v29 = vrot.slane %v817_v21, 2 }
 0x1ec   : > { %v819_v22 = vadd.f32 %v818_v29, %v817_v21 }
 0x1ee   : > { %v820_v23 = vrot.slane %v819_v22, 1 }
 0x1f0   : > { %v821_v25 = vadd.f32 %v820_v23, %v819_v22 }
 0x1f2   : > { %966 = vpush %v821_v25 }
 0x223   : > { %s967_s4 = spop %966 }
 0x224   : > { %v834_v34 = vstv %s967_s4 }
 0x225   : > { %v835_v36 = vsel %vm833_vm11, %v834_v34, 0.0 }
 0x226   : > { %v836_v0 = vadd.f32 %v835_v36, %v831_v35 }
 0x228   : > { %837 = vst [vmem:[%s201_s19] sm:$0xff] %v836_v0 }
 0x229   : > { %1106 = shalt.err (!%p1103_p11)
}
 0x22a   : > { %s1107_s30 = scalar_lea.hbm %s1582_s20, 128  ;;  %s1111_s26 = scalar_lea.hbm %s1628_s2, 256 }
 0x22b   : > { %p1108_p3 = scmp.ne.s32.totalorder %s1582_s20, %s1107_s30  ;;  %p1112_p2 = scmp.lt.u32.totalorder %s1582_s20, %s1628_s2 }
 0x22c   : > { %p1113_p4 = scmp.lt.u32.totalorder %s1111_s26, %s1107_s30  ;;  %p1115_p13 = scmp.lt.u32.totalorder %s1107_s30, %s1582_s20 }
 0x22d   : > { %p1109_p8 = pnand %p1108_p3, %p1638_p1 }
 0x22e   : > { %p1114_p6 = por %p1113_p4, %p1112_p2 }
 0x22f   : > { %p1110_p0 = pneg %p1109_p8 }
 0x230   : > { %p1116_p12 = por %p1115_p13, %p1114_p6 }
 0x232   : > { %p1117_p10 = pnand %p1116_p12, %p1110_p0 }
 0x234   : > { %1120 = shalt.err (!%p1117_p10)
}
 0x235   : > { %972 = dma.vmem_to_hbm [thread:$0]  (%p1638_p1), %s1584_s3, 128, %s1582_s20, %s839_s5  }
 0x236 PF: > { %s864_s7 = sand.u32 1, %s1151_s9   ;;  %p1639_p5 = scmp.ne.s32.totalorder %s1634_s22, 0 }
 0x237   : > { %p1640_p7 = scmp.ge.s32.totalorder %s1163_s12, 2  ;;  %s865_s8 = scalar_lea.sflag [#allocation4], %s864_s7 }
 0x239   : > { %p982_p9 = pnand %p1640_p7, %p1639_p5 }
 0x23b   : > { %1146 = dma.done.wait (!%p982_p9), %s865_s8, 128  }
 0x23c   : > { %1148 = vsyncadd (!%p982_p9), %s865_s8, 4294967168  ;;  %p18_p11 = scmp.ge.s32.totalorder %s1220_s15, 4   ;;  %s1641_s9 = smov %s1155_s10 }
 0x23d   : > { %s1642_s10 = smov %s1159_s11  ;;  %s1643_s11 = smov %s1232_s18 }
 0x23e   : > { %s1644_s12 = smov %s1220_s15  ;;  %20 = sbr.rel (!%p18_p11) target bundleno = 7 (0x7), region = 86 }
 0x245   :  { %870 = vsyncpa [#allocation3], 1 }
 0x246   :  { %872 = vsyncpa [#allocation3 + $0x1], 1 }
 0x247   :  { %873 = vsyncpa [#allocation6], 1 }
 0x248   :  { %875 = vsyncpa [#allocation6 + $0x1], 1 }
 0x249   :  { %876 = vsyncpa [#allocation4], 1 }
 0x24a   :  { %878 = vsyncpa [#allocation4 + $0x1], 1 }

</bundles_post_ra>
